<compile_context>
chip_gen: v7x
topology: tpu7x:2x2x1
jax: 0.10.0
libtpu: 0.0.40
codegen_flags: <defaults>
</compile_context>

<pallas_src>
import functools

import jax
import jax.numpy as jnp
from jax import lax
from jax.experimental import pallas as pl
from jax.experimental.pallas import tpu as pltpu


def _is_pow2(n):
    return n > 0 and (n & (n - 1)) == 0


def cnn_blocks_kernel(x_ref, w1_ref, b1_ref, w2_ref, b2_ref, alpha_ref,
                      out_ref, col_ref, *, H, W, Cp):
    """Whole folded batch in one step.

    x_ref     : (C, N*H*W)   channels on sublanes, batch*space on lanes
    w1_ref    : (C, 9*Cp)    conv1 weights, element [o, tap*Cp + i]
    b1_ref    : (C, 1)
    w2_ref    : (C, 9*Cp)    conv2 weights
    b2_ref    : (C, 1)
    alpha_ref : (1,) SMEM    PReLU shared slope (scalar)
    out_ref   : (C, N*H*W)
    col_ref   : (9*Cp, N*H*W) VMEM scratch holding the im2col operand
    """
    C = x_ref.shape[0]
    HW = H * W
    NHW = x_ref.shape[1]

    x = x_ref[...].astype(jnp.float32)                       # (C, NHW)

    # Per-lane row / column index within each image.  Hoisted once, reused by
    # both convs and all taps.  H, W are powers of two here -> cheap bit ops.
    idx = lax.broadcasted_iota(jnp.int32, (C, NHW), 1)
    if _is_pow2(W) and _is_pow2(H):
        w_idx = idx & (W - 1)
        h_idx = (idx >> (W.bit_length() - 1)) & (H - 1)
    else:  # generic fallback (not exercised at these shapes)
        hw = idx % HW
        h_idx = hw // W
        w_idx = hw - h_idx * W

    offsets = [(dh, dw) for dh in (-1, 0, 1) for dw in (-1, 0, 1)]

    # Per-tap validity masks implementing the convs' zero padding.  They also
    # kill any cross-image contamination introduced by rolling the flattened
    # (batch*space) axis, since offending pixels are always boundary pixels.
    def tap_mask(dh, dw):
        conds = []
        if dh == -1:
            conds.append(h_idx >= 1)
        elif dh == 1:
            conds.append(h_idx <= H - 2)
        if dw == -1:
            conds.append(w_idx >= 1)
        elif dw == 1:
            conds.append(w_idx <= W - 2)
        if not conds:
            return None
        m = conds[0]
        for c in conds[1:]:
            m = m & c
        return m

    masks = [tap_mask(dh, dw) for dh, dw in offsets]

    # Zero the im2col scratch once so the (Cp - C) padded rows per tap stay 0
    # (their weight columns are zero, but uninitialized VMEM could hold NaNs).
    col_ref[...] = jnp.zeros_like(col_ref)

    def conv3x3(inp, w_ref, b_ref):
        # Build the (9*Cp, NHW) im2col operand: tap t / channel i -> row t*Cp+i.
        for tap, (dh, dw) in enumerate(offsets):
            off = dh * W + dw
            if off == 0:
                shifted = inp
            else:
                # shifted[p] == inp[p + off]   (static lane roll on the XLU)
                shifted = pltpu.roll(inp, shift=(-off) % NHW, axis=1)
            if masks[tap] is not None:
                shifted = jnp.where(masks[tap], shifted, 0.0)
            col_ref[pl.ds(tap * Cp, C), :] = shifted          # aligned offset
        # Single MXU matmul per conv: (C, 9*Cp) x (9*Cp, NHW) -> (C, NHW).
        return jnp.dot(w_ref[...], col_ref[...],
                       preferred_element_type=jnp.float32) + b_ref[...]

    alpha = alpha_ref[0]
    y = conv3x3(x, w1_ref, b1_ref)
    y = jnp.where(y > 0, y, alpha * y)                        # PReLU
    y = conv3x3(y, w2_ref, b2_ref)
    out_ref[...] = (y + x).astype(out_ref.dtype)              # residual


def cnn_blocks_pallas(x_nchw, w1, b1, alpha, w2, b2):
    """x_nchw: (N, C, H, W) float32.  w1/w2 in PyTorch OIHW layout (C, C, 3, 3)."""
    N, C, H, W = x_nchw.shape
    HW = H * W
    NHW = N * HW
    Cp = -(-C // 8) * 8                      # per-tap channel stride (sublane-aligned)

    # Channel-major fold: (N, C, H, W) -> (C, N*H*W).  Tiny XLA transpose.
    x_cm = jnp.transpose(x_nchw, (1, 0, 2, 3)).reshape(C, NHW)

    # OIHW -> [o, kh, kw, i] -> [o, tap, i], pad cin to Cp, flatten to (C, 9*Cp).
    def pack_w(w):
        wt = jnp.transpose(w, (0, 2, 3, 1)).reshape(C, 9, C)
        wt = jnp.pad(wt, ((0, 0), (0, 0), (0, Cp - C)))
        return wt.reshape(C, 9 * Cp).astype(jnp.float32)

    w1_p, w2_p = pack_w(w1), pack_w(w2)
    b1_c = b1.reshape(C, 1).astype(jnp.float32)
    b2_c = b2.reshape(C, 1).astype(jnp.float32)
    alpha_a = jnp.asarray(alpha, jnp.float32).reshape(1)

    flops = 2 * (2 * NHW * 9 * C * C)                          # two 3x3 convs
    bytes_accessed = 4 * (2 * C * NHW + 2 * C * 9 * Cp + 2 * C + 1)

    kernel = functools.partial(cnn_blocks_kernel, H=H, W=W, Cp=Cp)
    out = pl.pallas_call(
        kernel,
        out_shape=jax.ShapeDtypeStruct((C, NHW), x_nchw.dtype),
        grid_spec=pltpu.PrefetchScalarGridSpec(
            num_scalar_prefetch=0,
            grid=(1,),
            in_specs=[
                pl.BlockSpec((C, NHW), lambda i: (0, 0)),
                pl.BlockSpec((C, 9 * Cp), lambda i: (0, 0)),
                pl.BlockSpec((C, 1), lambda i: (0, 0)),
                pl.BlockSpec((C, 9 * Cp), lambda i: (0, 0)),
                pl.BlockSpec((C, 1), lambda i: (0, 0)),
                pl.BlockSpec(memory_space=pltpu.MemorySpace.SMEM),
            ],
            out_specs=pl.BlockSpec((C, NHW), lambda i: (0, 0)),
            scratch_shapes=[pltpu.VMEM((9 * Cp, NHW), jnp.float32)],
        ),
        compiler_params=pltpu.CompilerParams(
            dimension_semantics=("arbitrary",)),
        cost_estimate=pl.CostEstimate(
            flops=flops, transcendentals=0, bytes_accessed=bytes_accessed),
    )(x_cm, w1_p, b1_c, w2_p, b2_c, alpha_a)
    return out.reshape(C, N, H, W).transpose(1, 0, 2, 3)


def cnn_blocks_reference(x_nchw, w1, b1, alpha, w2, b2):
    """Pure-JAX reference (NCHW / OIHW), mirrors the PyTorch module."""
    dn = lax.conv_dimension_numbers(x_nchw.shape, w1.shape,
                                    ("NCHW", "OIHW", "NCHW"))
    y = lax.conv_general_dilated(x_nchw, w1, (1, 1), "SAME",
                                 dimension_numbers=dn) + b1.reshape(1, -1, 1, 1)
    y = jnp.where(y > 0, y, alpha * y)
    y = lax.conv_general_dilated(y, w2, (1, 1), "SAME",
                                 dimension_numbers=dn) + b2.reshape(1, -1, 1, 1)
    return y + x_nchw


if __name__ == "__main__":
    N, C, H, W = 2, 4, 16, 16
    key = jax.random.PRNGKey(0)
    kx, kw1, kb1, kw2, kb2 = jax.random.split(key, 5)

    # Input and parameters mirror the PyTorch conventions
    # (NCHW input, Conv2d weights OIHW, PReLU() single slope = 0.25).
    x = jax.random.normal(kx, (N, C, H, W), jnp.float32)
    w1 = jax.random.normal(kw1, (C, C, 3, 3), jnp.float32) * 0.1
    b1 = jax.random.normal(kb1, (C,), jnp.float32) * 0.1
    w2 = jax.random.normal(kw2, (C, C, 3, 3), jnp.float32) * 0.1
    b2 = jax.random.normal(kb2, (C,), jnp.float32) * 0.1
    alpha = jnp.float32(0.25)

    out = cnn_blocks_pallas(x, w1, b1, alpha, w2, b2)
    out = jax.block_until_ready(out)

    ref = cnn_blocks_reference(x, w1, b1, alpha, w2, b2)
    if not jnp.allclose(out, ref, atol=1e-4, rtol=1e-4):
        raise AssertionError("Pallas kernel mismatch vs reference")

    assert out.shape == (N, C, H, W)
    print("KERNEL_OK")
</pallas_src>

<mosaic_0001>
module attributes {stable_mosaic.version = 11 : i64} {
  func.func @cnn_blocks_kernel(%arg0: i32, %arg1: memref<4x512xf32, #tpu.memory_space<vmem>>, %arg2: memref<4x72xf32, #tpu.memory_space<vmem>>, %arg3: memref<4x1xf32, #tpu.memory_space<vmem>>, %arg4: memref<4x72xf32, #tpu.memory_space<vmem>>, %arg5: memref<4x1xf32, #tpu.memory_space<vmem>>, %arg6: memref<1xf32, #tpu.memory_space<smem>>, %arg7: memref<4x512xf32, #tpu.memory_space<vmem>>, %arg8: memref<72x512xf32, #tpu.memory_space<vmem>>) attributes {dimension_semantics = [#tpu.dimension_semantics<arbitrary>], iteration_bounds = array<i64: 1>, scalar_prefetch = 0 : i64, scratch_operands = 1 : i64, tpu.core_type = #tpu.core_type<tc>, window_params = [{pipeline_mode = #tpu.pipeline_mode<synchronous>, transform_indices = @transform_0, window_bounds = array<i64: 4, 512>}, {pipeline_mode = #tpu.pipeline_mode<synchronous>, transform_indices = @transform_1, window_bounds = array<i64: 4, 72>}, {pipeline_mode = #tpu.pipeline_mode<synchronous>, transform_indices = @transform_2, window_bounds = array<i64: 4, 1>}, {pipeline_mode = #tpu.pipeline_mode<synchronous>, transform_indices = @transform_3, window_bounds = array<i64: 4, 72>}, {pipeline_mode = #tpu.pipeline_mode<synchronous>, transform_indices = @transform_4, window_bounds = array<i64: 4, 1>}, {transform_indices = @transform_5, window_bounds = array<i64: 1>}, {pipeline_mode = #tpu.pipeline_mode<synchronous>, transform_indices = @transform_6, window_bounds = array<i64: 4, 512>}]} {
    %c0 = arith.constant 0 : index
    %c0_0 = arith.constant 0 : index
    %0 = vector.load %arg1[%c0, %c0_0] : memref<4x512xf32, #tpu.memory_space<vmem>>, vector<4x512xf32>
    %1 = tpu.iota {dimensions = array<i32: 1>} : vector<4x512xi32>
    %c15_i32 = arith.constant 15 : i32
    %2 = vector.broadcast %c15_i32 : i32 to vector<4x512xi32>
    %3 = arith.andi %1, %2 : vector<4x512xi32>
    %c4_i32 = arith.constant 4 : i32
    %4 = vector.broadcast %c4_i32 : i32 to vector<4x512xi32>
    %5 = arith.shrsi %1, %4 : vector<4x512xi32>
    %c15_i32_1 = arith.constant 15 : i32
    %6 = vector.broadcast %c15_i32_1 : i32 to vector<4x512xi32>
    %7 = arith.andi %5, %6 : vector<4x512xi32>
    %c1_i32 = arith.constant 1 : i32
    %8 = vector.broadcast %c1_i32 : i32 to vector<4x512xi32>
    %9 = arith.cmpi sge, %7, %8 : vector<4x512xi32>
    %c1_i32_2 = arith.constant 1 : i32
    %10 = vector.broadcast %c1_i32_2 : i32 to vector<4x512xi32>
    %11 = arith.cmpi sge, %3, %10 : vector<4x512xi32>
    %12 = arith.andi %9, %11 : vector<4x512xi1>
    %c1_i32_3 = arith.constant 1 : i32
    %13 = vector.broadcast %c1_i32_3 : i32 to vector<4x512xi32>
    %14 = arith.cmpi sge, %7, %13 : vector<4x512xi32>
    %c1_i32_4 = arith.constant 1 : i32
    %15 = vector.broadcast %c1_i32_4 : i32 to vector<4x512xi32>
    %16 = arith.cmpi sge, %7, %15 : vector<4x512xi32>
    %c14_i32 = arith.constant 14 : i32
    %17 = vector.broadcast %c14_i32 : i32 to vector<4x512xi32>
    %18 = arith.cmpi sle, %3, %17 : vector<4x512xi32>
    %19 = arith.andi %16, %18 : vector<4x512xi1>
    %c1_i32_5 = arith.constant 1 : i32
    %20 = vector.broadcast %c1_i32_5 : i32 to vector<4x512xi32>
    %21 = arith.cmpi sge, %3, %20 : vector<4x512xi32>
    %c14_i32_6 = arith.constant 14 : i32
    %22 = vector.broadcast %c14_i32_6 : i32 to vector<4x512xi32>
    %23 = arith.cmpi sle, %3, %22 : vector<4x512xi32>
    %c14_i32_7 = arith.constant 14 : i32
    %24 = vector.broadcast %c14_i32_7 : i32 to vector<4x512xi32>
    %25 = arith.cmpi sle, %7, %24 : vector<4x512xi32>
    %c1_i32_8 = arith.constant 1 : i32
    %26 = vector.broadcast %c1_i32_8 : i32 to vector<4x512xi32>
    %27 = arith.cmpi sge, %3, %26 : vector<4x512xi32>
    %28 = arith.andi %25, %27 : vector<4x512xi1>
    %c14_i32_9 = arith.constant 14 : i32
    %29 = vector.broadcast %c14_i32_9 : i32 to vector<4x512xi32>
    %30 = arith.cmpi sle, %7, %29 : vector<4x512xi32>
    %c14_i32_10 = arith.constant 14 : i32
    %31 = vector.broadcast %c14_i32_10 : i32 to vector<4x512xi32>
    %32 = arith.cmpi sle, %7, %31 : vector<4x512xi32>
    %c14_i32_11 = arith.constant 14 : i32
    %33 = vector.broadcast %c14_i32_11 : i32 to vector<4x512xi32>
    %34 = arith.cmpi sle, %3, %33 : vector<4x512xi32>
    %35 = arith.andi %32, %34 : vector<4x512xi1>
    %cst = arith.constant 0.000000e+00 : f32
    %36 = vector.broadcast %cst : f32 to vector<72x512xf32>
    %c0_12 = arith.constant 0 : index
    %c0_13 = arith.constant 0 : index
    %37 = vector.load %arg8[%c0_12, %c0_13] : memref<72x512xf32, #tpu.memory_space<vmem>>, vector<72x512xf32>
    tpu.vector_store %arg8[%c0_12, %c0_13], %36 {strides = array<i32>} : memref<72x512xf32, #tpu.memory_space<vmem>>, vector<72x512xf32>,
    %c0_14 = arith.constant 0 : index
    %38 = memref.load %arg6[%c0_14] : memref<1xf32, #tpu.memory_space<smem>>
    %c17_i32 = arith.constant 17 : i32
    %39 = tpu.dynamic_rotate %0 by %c17_i32 dim 1 : vector<4x512xf32>, i32 -> vector<4x512xf32>
    %cst_15 = arith.constant 0.000000e+00 : f32
    %40 = vector.broadcast %cst_15 : f32 to vector<4x512xf32>
    %41 = arith.select %12, %39, %40 : vector<4x512xi1>, vector<4x512xf32>
    %c0_16 = arith.constant 0 : index
    %c0_17 = arith.constant 0 : index
    %42 = vector.load %arg8[%c0_16, %c0_17] : memref<72x512xf32, #tpu.memory_space<vmem>>, vector<4x512xf32>
    tpu.vector_store %arg8[%c0_16, %c0_17], %41 {strides = array<i32>} : memref<72x512xf32, #tpu.memory_space<vmem>>, vector<4x512xf32>,
    %c16_i32 = arith.constant 16 : i32
    %43 = tpu.dynamic_rotate %0 by %c16_i32 dim 1 : vector<4x512xf32>, i32 -> vector<4x512xf32>
    %cst_18 = arith.constant 0.000000e+00 : f32
    %44 = vector.broadcast %cst_18 : f32 to vector<4x512xf32>
    %45 = arith.select %14, %43, %44 : vector<4x512xi1>, vector<4x512xf32>
    %c8 = arith.constant 8 : index
    %c0_19 = arith.constant 0 : index
    %46 = vector.load %arg8[%c8, %c0_19] : memref<72x512xf32, #tpu.memory_space<vmem>>, vector<4x512xf32>
    tpu.vector_store %arg8[%c8, %c0_19], %45 {strides = array<i32>} : memref<72x512xf32, #tpu.memory_space<vmem>>, vector<4x512xf32>,
    %c15_i32_20 = arith.constant 15 : i32
    %47 = tpu.dynamic_rotate %0 by %c15_i32_20 dim 1 : vector<4x512xf32>, i32 -> vector<4x512xf32>
    %cst_21 = arith.constant 0.000000e+00 : f32
    %48 = vector.broadcast %cst_21 : f32 to vector<4x512xf32>
    %49 = arith.select %19, %47, %48 : vector<4x512xi1>, vector<4x512xf32>
    %c16 = arith.constant 16 : index
    %c0_22 = arith.constant 0 : index
    %50 = vector.load %arg8[%c16, %c0_22] : memref<72x512xf32, #tpu.memory_space<vmem>>, vector<4x512xf32>
    tpu.vector_store %arg8[%c16, %c0_22], %49 {strides = array<i32>} : memref<72x512xf32, #tpu.memory_space<vmem>>, vector<4x512xf32>,
    %c1_i32_23 = arith.constant 1 : i32
    %51 = tpu.dynamic_rotate %0 by %c1_i32_23 dim 1 : vector<4x512xf32>, i32 -> vector<4x512xf32>
    %cst_24 = arith.constant 0.000000e+00 : f32
    %52 = vector.broadcast %cst_24 : f32 to vector<4x512xf32>
    %53 = arith.select %21, %51, %52 : vector<4x512xi1>, vector<4x512xf32>
    %c24 = arith.constant 24 : index
    %c0_25 = arith.constant 0 : index
    %54 = vector.load %arg8[%c24, %c0_25] : memref<72x512xf32, #tpu.memory_space<vmem>>, vector<4x512xf32>
    tpu.vector_store %arg8[%c24, %c0_25], %53 {strides = array<i32>} : memref<72x512xf32, #tpu.memory_space<vmem>>, vector<4x512xf32>,
    %c32 = arith.constant 32 : index
    %c0_26 = arith.constant 0 : index
    %55 = vector.load %arg8[%c32, %c0_26] : memref<72x512xf32, #tpu.memory_space<vmem>>, vector<4x512xf32>
    tpu.vector_store %arg8[%c32, %c0_26], %0 {strides = array<i32>} : memref<72x512xf32, #tpu.memory_space<vmem>>, vector<4x512xf32>,
    %c511_i32 = arith.constant 511 : i32
    %56 = tpu.dynamic_rotate %0 by %c511_i32 dim 1 : vector<4x512xf32>, i32 -> vector<4x512xf32>
    %cst_27 = arith.constant 0.000000e+00 : f32
    %57 = vector.broadcast %cst_27 : f32 to vector<4x512xf32>
    %58 = arith.select %23, %56, %57 : vector<4x512xi1>, vector<4x512xf32>
    %c40 = arith.constant 40 : index
    %c0_28 = arith.constant 0 : index
    %59 = vector.load %arg8[%c40, %c0_28] : memref<72x512xf32, #tpu.memory_space<vmem>>, vector<4x512xf32>
    tpu.vector_store %arg8[%c40, %c0_28], %58 {strides = array<i32>} : memref<72x512xf32, #tpu.memory_space<vmem>>, vector<4x512xf32>,
    %c497_i32 = arith.constant 497 : i32
    %60 = tpu.dynamic_rotate %0 by %c497_i32 dim 1 : vector<4x512xf32>, i32 -> vector<4x512xf32>
    %cst_29 = arith.constant 0.000000e+00 : f32
    %61 = vector.broadcast %cst_29 : f32 to vector<4x512xf32>
    %62 = arith.select %28, %60, %61 : vector<4x512xi1>, vector<4x512xf32>
    %c48 = arith.constant 48 : index
    %c0_30 = arith.constant 0 : index
    %63 = vector.load %arg8[%c48, %c0_30] : memref<72x512xf32, #tpu.memory_space<vmem>>, vector<4x512xf32>
    tpu.vector_store %arg8[%c48, %c0_30], %62 {strides = array<i32>} : memref<72x512xf32, #tpu.memory_space<vmem>>, vector<4x512xf32>,
    %c496_i32 = arith.constant 496 : i32
    %64 = tpu.dynamic_rotate %0 by %c496_i32 dim 1 : vector<4x512xf32>, i32 -> vector<4x512xf32>
    %cst_31 = arith.constant 0.000000e+00 : f32
    %65 = vector.broadcast %cst_31 : f32 to vector<4x512xf32>
    %66 = arith.select %30, %64, %65 : vector<4x512xi1>, vector<4x512xf32>
    %c56 = arith.constant 56 : index
    %c0_32 = arith.constant 0 : index
    %67 = vector.load %arg8[%c56, %c0_32] : memref<72x512xf32, #tpu.memory_space<vmem>>, vector<4x512xf32>
    tpu.vector_store %arg8[%c56, %c0_32], %66 {strides = array<i32>} : memref<72x512xf32, #tpu.memory_space<vmem>>, vector<4x512xf32>,
    %c495_i32 = arith.constant 495 : i32
    %68 = tpu.dynamic_rotate %0 by %c495_i32 dim 1 : vector<4x512xf32>, i32 -> vector<4x512xf32>
    %cst_33 = arith.constant 0.000000e+00 : f32
    %69 = vector.broadcast %cst_33 : f32 to vector<4x512xf32>
    %70 = arith.select %35, %68, %69 : vector<4x512xi1>, vector<4x512xf32>
    %c64 = arith.constant 64 : index
    %c0_34 = arith.constant 0 : index
    %71 = vector.load %arg8[%c64, %c0_34] : memref<72x512xf32, #tpu.memory_space<vmem>>, vector<4x512xf32>
    tpu.vector_store %arg8[%c64, %c0_34], %70 {strides = array<i32>} : memref<72x512xf32, #tpu.memory_space<vmem>>, vector<4x512xf32>,
    %c0_35 = arith.constant 0 : index
    %c0_36 = arith.constant 0 : index
    %72 = vector.load %arg2[%c0_35, %c0_36] : memref<4x72xf32, #tpu.memory_space<vmem>>, vector<4x72xf32>
    %c0_37 = arith.constant 0 : index
    %c0_38 = arith.constant 0 : index
    %73 = vector.load %arg8[%c0_37, %c0_38] : memref<72x512xf32, #tpu.memory_space<vmem>>, vector<72x512xf32>
    %cst_39 = arith.constant dense<0.000000e+00> : vector<4x512xf32>
    %74 = tpu.matmul %72, %73, %cst_39 {dimension_numbers = #tpu.dot_dimension_numbers<[1], [0], [0], [1], [0, 0, 1, 1], [], []>} : vector<4x72xf32>, vector<72x512xf32>, vector<4x512xf32> -> vector<4x512xf32>
    %c0_40 = arith.constant 0 : index
    %c0_41 = arith.constant 0 : index
    %75 = vector.load %arg3[%c0_40, %c0_41] : memref<4x1xf32, #tpu.memory_space<vmem>>, vector<4x1xf32>
    %76 = vector.broadcast %75 : vector<4x1xf32> to vector<4x512xf32>
    %77 = arith.addf %74, %76 : vector<4x512xf32>
    %cst_42 = arith.constant 0.000000e+00 : f32
    %78 = vector.broadcast %cst_42 : f32 to vector<4x512xf32>
    %79 = arith.cmpf ogt, %77, %78 : vector<4x512xf32>
    %80 = vector.broadcast %38 : f32 to vector<4x512xf32>
    %81 = arith.mulf %80, %77 : vector<4x512xf32>
    %82 = arith.select %79, %77, %81 : vector<4x512xi1>, vector<4x512xf32>
    %c17_i32_43 = arith.constant 17 : i32
    %83 = tpu.dynamic_rotate %82 by %c17_i32_43 dim 1 : vector<4x512xf32>, i32 -> vector<4x512xf32>
    %cst_44 = arith.constant 0.000000e+00 : f32
    %84 = vector.broadcast %cst_44 : f32 to vector<4x512xf32>
    %85 = arith.select %12, %83, %84 : vector<4x512xi1>, vector<4x512xf32>
    %c0_45 = arith.constant 0 : index
    %c0_46 = arith.constant 0 : index
    %86 = vector.load %arg8[%c0_45, %c0_46] : memref<72x512xf32, #tpu.memory_space<vmem>>, vector<4x512xf32>
    tpu.vector_store %arg8[%c0_45, %c0_46], %85 {strides = array<i32>} : memref<72x512xf32, #tpu.memory_space<vmem>>, vector<4x512xf32>,
    %c16_i32_47 = arith.constant 16 : i32
    %87 = tpu.dynamic_rotate %82 by %c16_i32_47 dim 1 : vector<4x512xf32>, i32 -> vector<4x512xf32>
    %cst_48 = arith.constant 0.000000e+00 : f32
    %88 = vector.broadcast %cst_48 : f32 to vector<4x512xf32>
    %89 = arith.select %14, %87, %88 : vector<4x512xi1>, vector<4x512xf32>
    %c8_49 = arith.constant 8 : index
    %c0_50 = arith.constant 0 : index
    %90 = vector.load %arg8[%c8_49, %c0_50] : memref<72x512xf32, #tpu.memory_space<vmem>>, vector<4x512xf32>
    tpu.vector_store %arg8[%c8_49, %c0_50], %89 {strides = array<i32>} : memref<72x512xf32, #tpu.memory_space<vmem>>, vector<4x512xf32>,
    %c15_i32_51 = arith.constant 15 : i32
    %91 = tpu.dynamic_rotate %82 by %c15_i32_51 dim 1 : vector<4x512xf32>, i32 -> vector<4x512xf32>
    %cst_52 = arith.constant 0.000000e+00 : f32
    %92 = vector.broadcast %cst_52 : f32 to vector<4x512xf32>
    %93 = arith.select %19, %91, %92 : vector<4x512xi1>, vector<4x512xf32>
    %c16_53 = arith.constant 16 : index
    %c0_54 = arith.constant 0 : index
    %94 = vector.load %arg8[%c16_53, %c0_54] : memref<72x512xf32, #tpu.memory_space<vmem>>, vector<4x512xf32>
    tpu.vector_store %arg8[%c16_53, %c0_54], %93 {strides = array<i32>} : memref<72x512xf32, #tpu.memory_space<vmem>>, vector<4x512xf32>,
    %c1_i32_55 = arith.constant 1 : i32
    %95 = tpu.dynamic_rotate %82 by %c1_i32_55 dim 1 : vector<4x512xf32>, i32 -> vector<4x512xf32>
    %cst_56 = arith.constant 0.000000e+00 : f32
    %96 = vector.broadcast %cst_56 : f32 to vector<4x512xf32>
    %97 = arith.select %21, %95, %96 : vector<4x512xi1>, vector<4x512xf32>
    %c24_57 = arith.constant 24 : index
    %c0_58 = arith.constant 0 : index
    %98 = vector.load %arg8[%c24_57, %c0_58] : memref<72x512xf32, #tpu.memory_space<vmem>>, vector<4x512xf32>
    tpu.vector_store %arg8[%c24_57, %c0_58], %97 {strides = array<i32>} : memref<72x512xf32, #tpu.memory_space<vmem>>, vector<4x512xf32>,
    %c32_59 = arith.constant 32 : index
    %c0_60 = arith.constant 0 : index
    %99 = vector.load %arg8[%c32_59, %c0_60] : memref<72x512xf32, #tpu.memory_space<vmem>>, vector<4x512xf32>
    tpu.vector_store %arg8[%c32_59, %c0_60], %82 {strides = array<i32>} : memref<72x512xf32, #tpu.memory_space<vmem>>, vector<4x512xf32>,
    %c511_i32_61 = arith.constant 511 : i32
    %100 = tpu.dynamic_rotate %82 by %c511_i32_61 dim 1 : vector<4x512xf32>, i32 -> vector<4x512xf32>
    %cst_62 = arith.constant 0.000000e+00 : f32
    %101 = vector.broadcast %cst_62 : f32 to vector<4x512xf32>
    %102 = arith.select %23, %100, %101 : vector<4x512xi1>, vector<4x512xf32>
    %c40_63 = arith.constant 40 : index
    %c0_64 = arith.constant 0 : index
    %103 = vector.load %arg8[%c40_63, %c0_64] : memref<72x512xf32, #tpu.memory_space<vmem>>, vector<4x512xf32>
    tpu.vector_store %arg8[%c40_63, %c0_64], %102 {strides = array<i32>} : memref<72x512xf32, #tpu.memory_space<vmem>>, vector<4x512xf32>,
    %c497_i32_65 = arith.constant 497 : i32
    %104 = tpu.dynamic_rotate %82 by %c497_i32_65 dim 1 : vector<4x512xf32>, i32 -> vector<4x512xf32>
    %cst_66 = arith.constant 0.000000e+00 : f32
    %105 = vector.broadcast %cst_66 : f32 to vector<4x512xf32>
    %106 = arith.select %28, %104, %105 : vector<4x512xi1>, vector<4x512xf32>
    %c48_67 = arith.constant 48 : index
    %c0_68 = arith.constant 0 : index
    %107 = vector.load %arg8[%c48_67, %c0_68] : memref<72x512xf32, #tpu.memory_space<vmem>>, vector<4x512xf32>
    tpu.vector_store %arg8[%c48_67, %c0_68], %106 {strides = array<i32>} : memref<72x512xf32, #tpu.memory_space<vmem>>, vector<4x512xf32>,
    %c496_i32_69 = arith.constant 496 : i32
    %108 = tpu.dynamic_rotate %82 by %c496_i32_69 dim 1 : vector<4x512xf32>, i32 -> vector<4x512xf32>
    %cst_70 = arith.constant 0.000000e+00 : f32
    %109 = vector.broadcast %cst_70 : f32 to vector<4x512xf32>
    %110 = arith.select %30, %108, %109 : vector<4x512xi1>, vector<4x512xf32>
    %c56_71 = arith.constant 56 : index
    %c0_72 = arith.constant 0 : index
    %111 = vector.load %arg8[%c56_71, %c0_72] : memref<72x512xf32, #tpu.memory_space<vmem>>, vector<4x512xf32>
    tpu.vector_store %arg8[%c56_71, %c0_72], %110 {strides = array<i32>} : memref<72x512xf32, #tpu.memory_space<vmem>>, vector<4x512xf32>,
    %c495_i32_73 = arith.constant 495 : i32
    %112 = tpu.dynamic_rotate %82 by %c495_i32_73 dim 1 : vector<4x512xf32>, i32 -> vector<4x512xf32>
    %cst_74 = arith.constant 0.000000e+00 : f32
    %113 = vector.broadcast %cst_74 : f32 to vector<4x512xf32>
    %114 = arith.select %35, %112, %113 : vector<4x512xi1>, vector<4x512xf32>
    %c64_75 = arith.constant 64 : index
    %c0_76 = arith.constant 0 : index
    %115 = vector.load %arg8[%c64_75, %c0_76] : memref<72x512xf32, #tpu.memory_space<vmem>>, vector<4x512xf32>
    tpu.vector_store %arg8[%c64_75, %c0_76], %114 {strides = array<i32>} : memref<72x512xf32, #tpu.memory_space<vmem>>, vector<4x512xf32>,
    %c0_77 = arith.constant 0 : index
    %c0_78 = arith.constant 0 : index
    %116 = vector.load %arg4[%c0_77, %c0_78] : memref<4x72xf32, #tpu.memory_space<vmem>>, vector<4x72xf32>
    %c0_79 = arith.constant 0 : index
    %c0_80 = arith.constant 0 : index
    %117 = vector.load %arg8[%c0_79, %c0_80] : memref<72x512xf32, #tpu.memory_space<vmem>>, vector<72x512xf32>
    %cst_81 = arith.constant dense<0.000000e+00> : vector<4x512xf32>
    %118 = tpu.matmul %116, %117, %cst_81 {dimension_numbers = #tpu.dot_dimension_numbers<[1], [0], [0], [1], [0, 0, 1, 1], [], []>} : vector<4x72xf32>, vector<72x512xf32>, vector<4x512xf32> -> vector<4x512xf32>
    %c0_82 = arith.constant 0 : index
    %c0_83 = arith.constant 0 : index
    %119 = vector.load %arg5[%c0_82, %c0_83] : memref<4x1xf32, #tpu.memory_space<vmem>>, vector<4x1xf32>
    %120 = vector.broadcast %119 : vector<4x1xf32> to vector<4x512xf32>
    %121 = arith.addf %118, %120 : vector<4x512xf32>
    %122 = arith.addf %121, %0 : vector<4x512xf32>
    %c0_84 = arith.constant 0 : index
    %c0_85 = arith.constant 0 : index
    %123 = vector.load %arg7[%c0_84, %c0_85] : memref<4x512xf32, #tpu.memory_space<vmem>>, vector<4x512xf32>
    tpu.vector_store %arg7[%c0_84, %c0_85], %122 {strides = array<i32>} : memref<4x512xf32, #tpu.memory_space<vmem>>, vector<4x512xf32>,
    return
  }
  func.func @transform_0(%arg0: i32) -> (i32, i32) {
    %c0_i32 = arith.constant 0 : i32
    %c0_i32_0 = arith.constant 0 : i32
    %c0_i32_1 = arith.constant 0 : i32
    return %c0_i32, %c0_i32_0 : i32, i32
  }
  func.func @transform_1(%arg0: i32) -> (i32, i32) {
    %c0_i32 = arith.constant 0 : i32
    %c0_i32_0 = arith.constant 0 : i32
    %c0_i32_1 = arith.constant 0 : i32
    return %c0_i32, %c0_i32_0 : i32, i32
  }
  func.func @transform_2(%arg0: i32) -> (i32, i32) {
    %c0_i32 = arith.constant 0 : i32
    %c0_i32_0 = arith.constant 0 : i32
    %c0_i32_1 = arith.constant 0 : i32
    return %c0_i32, %c0_i32_0 : i32, i32
  }
  func.func @transform_3(%arg0: i32) -> (i32, i32) {
    %c0_i32 = arith.constant 0 : i32
    %c0_i32_0 = arith.constant 0 : i32
    %c0_i32_1 = arith.constant 0 : i32
    return %c0_i32, %c0_i32_0 : i32, i32
  }
  func.func @transform_4(%arg0: i32) -> (i32, i32) {
    %c0_i32 = arith.constant 0 : i32
    %c0_i32_0 = arith.constant 0 : i32
    %c0_i32_1 = arith.constant 0 : i32
    return %c0_i32, %c0_i32_0 : i32, i32
  }
  func.func @transform_5(%arg0: i32) -> i32 {
    %c0_i32 = arith.constant 0 : i32
    %c0_i32_0 = arith.constant 0 : i32
    return %c0_i32 : i32
  }
  func.func @transform_6(%arg0: i32) -> (i32, i32) {
    %c0_i32 = arith.constant 0 : i32
    %c0_i32_0 = arith.constant 0 : i32
    %c0_i32_1 = arith.constant 0 : i32
    return %c0_i32, %c0_i32_0 : i32, i32
  }
}

</mosaic_0001>

<bundles_post_ra>
// kernel: tpu_custom_call.1
= control target key start
LH: loop header
LB: loop body
LE: loop exit
PB: predicated region body
PF: predicated region fallthrough
CT: control target
= control target key end

     0   :  { %12 = vsyncpa [#allocation5], 0  ;;  %s1714_s0 = inlined_call_operand.hbm [shape: f32[4,512], index: 0, kind: input, shape index: {}]   ;;  %s1715_s1 = inlined_call_operand.vmem [shape: f32[4,72], index: 1, kind: input, shape index: {}]   ;;  %s1716_s2 = inlined_call_operand.vmem [shape: f32[4,1], index: 2, kind: input, shape index: {}]   ;;  %s1717_s3 = inlined_call_operand.vmem [shape: f32[4,72], index: 3, kind: input, shape index: {}]   ;;  %s1718_s4 = inlined_call_operand.vmem [shape: f32[4,1], index: 4, kind: input, shape index: {}]   ;;  %s1719_s5 = inlined_call_operand.<no memory space> [shape: f32[1], index: 5, kind: input, shape index: {}]   ;;  %s1720_s6 = inlined_call_operand.hbm [shape: f32[4,512], index: 6, kind: output, shape index: {}]  }
   0x1   :  { %13 = vsyncpa [#allocation6], 0  ;;  %s1017_s21 = smov [#allocation4]   ;;  %s969_s25 = scalar_lea.hbm %s1714_s0, 256 }
   0x2   :  { %s20_s22 = sshll.u32 %s1017_s21, 4  ;;  %p970_p0 = scmp.ne.s32.totalorder %s1714_s0, %s969_s25  ;;  %s21_s22 = int_to_ptr.vmem [resolvable:$true] %s20_s22 }
   0x3   :  { %p973_p1 = scmp.lt.u32.totalorder %s969_s25, %s1714_s0 }
   0x5   :  { %p975_p2 = pnand %p973_p1, %p970_p0 }
   0x7   :  { %978 = shalt.err (!%p975_p2)
}
   0x8   :  { %s979_s30 = scalar_lea.vmem %s21_s22, 256  ;;  %p984_p4 = scmp.lt.s32.totalorder %s21_s22, %s21_s22 }
   0x9   :  { %p980_p3 = scmp.ne.s32.totalorder %s21_s22, %s979_s30  ;;  %p985_p5 = scmp.lt.s32.totalorder %s979_s30, %s979_s30 }
   0xb   :  { %p986_p6 = por %p985_p5, %p984_p4 }
   0xd   :  { %p987_p7 = pnand %p986_p6, %p980_p3 }
   0xf   :  { %990 = shalt.err (!%p987_p7)
}
  0x10   :  { %23 = dma.hbm_to_vmem [thread:$0]  %s1714_s0, 256, %s21_s22, [#allocation5]  }
  0x11   :  { %1013 = dma.done.wait [#allocation5], 256  }
  0x12   :  { %1014 = vsyncadd [#allocation5], 4294967040  ;;  %v1018_v0 = vmov 0.0   ;;  %v1114_v1 = vld [vmem:[#allocation4 + $0x8] sm:$0xff]  ;;  %v1116_v2 = vld [vmem:[#allocation4] sm:$0xff]  ;;  %s1019_s0 = smov 17   ;;  %v39_v7 = vlaneseq }
  0x13   :  { %88 = vst [vmem:[#allocation2] sm:$0xff] %v1018_v0  ;;  %91 = vst [vmem:[#allocation2 + $0x18] sm:$0xff] %v1018_v0  ;;  %414 = vmatprep.mubr.f32.mxu0 %v1018_v0  ;;  %485 = vmatprep.mubr.f32.mxu1 %v1018_v0  ;;  %v1124_v3 = vcombine.high %v1114_v1, %v1114_v1  ;;  %v1128_v4 = vcombine.high %v1116_v2, %v1116_v2  ;;  %s1020_s9 = smov 16   ;;  %s1021_s10 = smov 15   ;;  %v1027_v5 = vmov 0   ;;  %v1750_v20 = vmov 0 }
  0x14   :  { %89 = vst [vmem:[#allocation2 + $0x8] sm:$0xff] %v1018_v0  ;;  %90 = vst [vmem:[#allocation2 + $0x10] sm:$0xff] %v1018_v0  ;;  %135 = vrot.lane.b32.xlu1 %v1114_v1, %s1019_s0  ;;  %131 = vrot.lane.b32.xlu0 %v1116_v2, %s1019_s0  ;;  %s1022_s11 = smov 1   ;;  %s1023_s12 = smov 127   ;;  %v340_v6 = vld [vmem:[%s1716_s2] sm:$0xf] }
  0x15   :  { %92 = vst [vmem:[#allocation2 + $0x20] sm:$0xff] %v1018_v0  ;;  %93 = vst [vmem:[#allocation2 + $0x28] sm:$0xff] %v1018_v0  ;;  %s1024_s13 = smov 113   ;;  %s1025_s14 = smov 112   ;;  %966 = vset.pattern.permute.xlu0 %v1027_v5  ;;  %v1197_v8 = vand.u32 127, %v39_v7  ;;  %v1752_v25 = vmov 0 }
  0x16   :  { %94 = vst [vmem:[#allocation2 + $0x30] sm:$0xff] %v1018_v0  ;;  %95 = vst [vmem:[#allocation2 + $0x38] sm:$0xff] %v1018_v0  ;;  %s1026_s15 = smov 111   ;;  %v1754_v28 = vmov 0  ;;  %v1756_v29 = vmov 0  ;;  %v1758_v30 = vmov 0 }
  0x17   :  { %96 = vst [vmem:[#allocation2 + $0x40] sm:$0xff] %v1018_v0  ;;  %97 = vst [vmem:[#allocation2 + $0x48] sm:$0xff] %v1018_v0  ;;  %v1200_v9 = vadd.s32 384, %v1197_v8  ;;  %v48_v10 = vshra.s32 %v1197_v8, 4  ;;  %v41_v11 = vadd.s32 128, %v1197_v8  ;;  %v42_v13 = vadd.s32 256, %v1197_v8 }
  0x18   :  { %98 = vst [vmem:[#allocation2 + $0x50] sm:$0xff] %v1018_v0  ;;  %99 = vst [vmem:[#allocation2 + $0x58] sm:$0xff] %v1018_v0  ;;  %137 = vrot.lane.b32.xlu1 %v1124_v3, %s1019_s0  ;;  %152 = vrot.lane.b32.xlu0 %v1116_v2, %s1020_s9  ;;  %v44_v14 = vand.u32 15, %v1197_v8  ;;  %vm1721_vm5 = vcmp.lt.s32.totalorder %v1197_v8, 17  ;;  %vm1722_vm11 = vcmp.lt.s32.totalorder %v1197_v8, 16  ;;  %v1762_v38 = vmov 0 }
  0x19   :  { %100 = vst [vmem:[#allocation2 + $0x60] sm:$0xff] %v1018_v0  ;;  %101 = vst [vmem:[#allocation2 + $0x68] sm:$0xff] %v1018_v0  ;;  %v51_v12 = vshra.s32 %v1200_v9, 4  ;;  %v1207_v15 = vand.u32 15, %v48_v10  ;;  %v49_v16 = vshra.s32 %v41_v11, 4  ;;  %v47_v17 = vand.u32 15, %v1200_v9 }
  0x1a   :  { %102 = vst [vmem:[#allocation2 + $0x70] sm:$0xff] %v1018_v0  ;;  %103 = vst [vmem:[#allocation2 + $0x78] sm:$0xff] %v1018_v0  ;;  %v50_v19 = vshra.s32 %v42_v13, 4  ;;  %vm1213_vm1 = vcmp.ge.s32.totalorder %v44_v14, 1  ;;  %v45_v22 = vand.u32 15, %v41_v11  ;;  %v46_v26 = vand.u32 15, %v42_v13 }
  0x1b   :  { %104 = vst [vmem:[#allocation2 + $0x80] sm:$0xff] %v1018_v0  ;;  %105 = vst [vmem:[#allocation2 + $0x88] sm:$0xff] %v1018_v0  ;;  %v1210_v18 = vand.u32 15, %v51_v12  ;;  %vm1723_vm0 = vcmp.ge.s32.totalorder %v1207_v15, 1  ;;  %v1751_v20 = vsel %vm1213_vm1, 4294967295, %v1750_v20  ;;  %v1217_v21 = vand.u32 15, %v49_v16 }
  0x1c   :  { %106 = vst [vmem:[#allocation2 + $0x90] sm:$0xff] %v1018_v0  ;;  %107 = vst [vmem:[#allocation2 + $0x98] sm:$0xff] %v1018_v0  ;;  %154 = vrot.lane.b32.xlu1 %v1128_v4, %s1020_s9  ;;  %133 = vrot.lane.b32.xlu0 %v1128_v4, %s1019_s0  ;;  %vm1220_vm3 = vcmp.ge.s32.totalorder %v47_v17, 1  ;;  %v1224_v27 = vand.u32 15, %v50_v19  ;;  %vm1244_vm8 = vcmp.ge.s32.totalorder %v45_v22, 1  ;;  %vm1249_vm10 = vcmp.ge.s32.totalorder %v46_v26, 1 }
  0x1d   :  { %108 = vst [vmem:[#allocation2 + $0xa0] sm:$0xff] %v1018_v0  ;;  %109 = vst [vmem:[#allocation2 + $0xa8] sm:$0xff] %v1018_v0  ;;  %vm1724_vm2 = vcmp.ge.s32.totalorder %v1210_v18, 1  ;;  %v1753_v25 = vsel %vm1220_vm3, 4294967295, %v1752_v25  ;;  %vm1725_vm7 = vcmp.ge.s32.totalorder %v1217_v21, 1  ;;  %v1759_v30 = vsel %vm1244_vm8, 4294967295, %v1758_v30 }
  0x1e   :  { %110 = vst [vmem:[#allocation2 + $0xb0] sm:$0xff] %v1018_v0  ;;  %111 = vst [vmem:[#allocation2 + $0xb8] sm:$0xff] %v1018_v0  ;;  %vm1726_vm9 = vcmp.ge.s32.totalorder %v1224_v27, 1  ;;  %v1764_v39 = vmov 0  ;;  %vm1290_vm14 = vcmp.le.s32.totalorder %v45_v22, 14  ;;  %vm1729_vm15 = vcmp.lt.s32.totalorder %v1197_v8, 15 }
  0x1f   :  { %112 = vst [vmem:[#allocation2 + $0xc0] sm:$0xff] %v1018_v0  ;;  %113 = vst [vmem:[#allocation2 + $0xc8] sm:$0xff] %v1018_v0  ;;  %v1770_v58 = vmov 0 }
  0x20   :  { %114 = vst [vmem:[#allocation2 + $0xd0] sm:$0xff] %v1018_v0  ;;  %115 = vst [vmem:[#allocation2 + $0xd8] sm:$0xff] %v1018_v0  ;;  %158 = vrot.lane.b32.xlu1 %v1124_v3, %s1020_s9  ;;  %156 = vrot.lane.b32.xlu0 %v1114_v1, %s1020_s9 }
  0x21   :  { %116 = vst [vmem:[#allocation2 + $0xe0] sm:$0xff] %v1018_v0  ;;  %117 = vst [vmem:[#allocation2 + $0xe8] sm:$0xff] %v1018_v0 }
  0x22   :  { %118 = vst [vmem:[#allocation2 + $0xf0] sm:$0xff] %v1018_v0  ;;  %119 = vst [vmem:[#allocation2 + $0xf8] sm:$0xff] %v1018_v0 }
  0x23   :  { %120 = vst [vmem:[#allocation2 + $0x100] sm:$0xff] %v1018_v0  ;;  %121 = vst [vmem:[#allocation2 + $0x108] sm:$0xff] %v1018_v0 }
  0x24   :  { %122 = vst [vmem:[#allocation2 + $0x110] sm:$0xff] %v1018_v0  ;;  %123 = vst [vmem:[#allocation2 + $0x118] sm:$0xff] %v1018_v0  ;;  %175 = vrot.lane.b32.xlu1 %v1128_v4, %s1021_s10  ;;  %173 = vrot.lane.b32.xlu0 %v1116_v2, %s1021_s10 }
  0x25   :  { %215 = vst [vmem:[#allocation2 + $0x80] sm:$0xf] %v1116_v2  ;;  %217 = vst [vmem:[#allocation2 + $0x90] sm:$0xf] %v1114_v1 }
  0x26   :  { %216 = vst [vmem:[#allocation2 + $0x88] sm:$0xf] %v1128_v4  ;;  %218 = vst [vmem:[#allocation2 + $0x98] sm:$0xf] %v1124_v3 }
  0x27   :  { %vm1230_vm4 = vmand %vm1723_vm0, %vm1213_vm1 }
  0x28   :  { %179 = vrot.lane.b32.xlu1 %v1124_v3, %s1021_s10  ;;  %177 = vrot.lane.b32.xlu0 %v1114_v1, %s1021_s10  ;;  %v1755_v28 = vsel %vm1230_vm4, 4294967295, %v1754_v28  ;;  %vm1239_vm6 = vmand %vm1724_vm2, %vm1220_vm3 }
  0x29   :  { %v1757_v29 = vsel %vm1239_vm6, 4294967295, %v1756_v29  ;;  %vm1266_vm12 = vmand %vm1725_vm7, %vm1244_vm8 }
  0x2a   :  { %v1763_v38 = vsel %vm1266_vm12, 4294967295, %v1762_v38  ;;  %vm1274_vm13 = vmand %vm1726_vm9, %vm1249_vm10 }
  0x2b   :  { %v1765_v39 = vsel %vm1274_vm13, 4294967295, %v1764_v39 }
  0x2c   :  { %196 = vrot.lane.b32.xlu1 %v1128_v4, %s1022_s11  ;;  %194 = vrot.lane.b32.xlu0 %v1116_v2, %s1022_s11 }
  0x30   :  { %200 = vrot.lane.b32.xlu1 %v1124_v3, %s1022_s11  ;;  %198 = vrot.lane.b32.xlu0 %v1114_v1, %s1022_s11 }
  0x34   :  { %221 = vrot.lane.b32.xlu1 %v1128_v4, %s1023_s12  ;;  %219 = vrot.lane.b32.xlu0 %v1116_v2, %s1023_s12 }
  0x38   :  { %225 = vrot.lane.b32.xlu1 %v1124_v3, %s1023_s12  ;;  %223 = vrot.lane.b32.xlu0 %v1114_v1, %s1023_s12 }
  0x3c   :  { %242 = vrot.lane.b32.xlu1 %v1128_v4, %s1024_s13  ;;  %240 = vrot.lane.b32.xlu0 %v1116_v2, %s1024_s13 }
  0x40   :  { %246 = vrot.lane.b32.xlu1 %v1124_v3, %s1024_s13  ;;  %244 = vrot.lane.b32.xlu0 %v1114_v1, %s1024_s13 }
  0x44   :  { %263 = vrot.lane.b32.xlu1 %v1128_v4, %s1025_s14  ;;  %261 = vrot.lane.b32.xlu0 %v1116_v2, %s1025_s14 }
  0x48   :  { %267 = vrot.lane.b32.xlu1 %v1124_v3, %s1025_s14  ;;  %265 = vrot.lane.b32.xlu0 %v1114_v1, %s1025_s14 }
  0x4c   :  { %284 = vrot.lane.b32.xlu1 %v1128_v4, %s1026_s15  ;;  %282 = vrot.lane.b32.xlu0 %v1116_v2, %s1026_s15 }
  0x50   :  { %288 = vrot.lane.b32.xlu1 %v1124_v3, %s1026_s15  ;;  %286 = vrot.lane.b32.xlu0 %v1114_v1, %s1026_s15 }
  0x54   :  { %343 = vperm.xlu0 %966, %v340_v6  }
  0x86   :  { %v136_v23 = vpop.permute.xlu1 %135  ;;  %v132_v24 = vpop.permute.xlu0 %131 }
  0x8a   :  { %v138_v31 = vpop.permute.xlu1 %137  ;;  %v153_v32 = vpop.permute.xlu0 %152 }
  0x8b   :  { %v140_v34 = vsel %vm1721_vm5, %v136_v23, %v138_v31  ;;  %v143_v35 = vsel %vm1721_vm5, %v138_v31, %v132_v24 }
  0x8c   :  { %v144_v36 = vsel %vm1230_vm4, %v143_v35, 0.0  ;;  %v147_v37 = vsel %vm1239_vm6, %v140_v34, 0.0  ;;  %vm1779_vm6 = vcmp.ge.s32.totalorder %v1224_v27, 1 }
  0x8d   :  { %148 = vst [vmem:[#allocation2] sm:$0xf] %v144_v36  ;;  %151 = vst [vmem:[#allocation2 + $0x18] sm:$0xf] %v147_v37 }
  0x8e   :  { %v155_v40 = vpop.permute.xlu1 %154  ;;  %v134_v41 = vpop.permute.xlu0 %133 }
  0x8f   :  { %v163_v42 = vsel %vm1722_vm11, %v153_v32, %v155_v40  ;;  %v141_v43 = vsel %vm1721_vm5, %v134_v41, %v136_v23  ;;  %v142_v44 = vsel %vm1721_vm5, %v132_v24, %v134_v41  ;;  %vm1307_vm5 = vcmp.le.s32.totalorder %v44_v14, 14 }
  0x90   :  { %v166_v45 = vsel %vm1725_vm7, %v163_v42, 0.0  ;;  %v145_v46 = vsel %vm1266_vm12, %v142_v44, 0.0  ;;  %v146_v47 = vsel %vm1274_vm13, %v141_v43, 0.0  ;;  %vm1734_vm12 = vcmp.lt.s32.totalorder %v1197_v8, 1 }
  0x91   :  { %170 = vst [vmem:[#allocation2 + $0x28] sm:$0xf] %v166_v45  ;;  %149 = vst [vmem:[#allocation2 + $0x8] sm:$0xf] %v145_v46 }
  0x92   :  { %150 = vst [vmem:[#allocation2 + $0x10] sm:$0xf] %v146_v47  ;;  %v159_v48 = vpop.permute.xlu1 %158  ;;  %v157_v49 = vpop.permute.xlu0 %156 }
  0x93   :  { %v164_v51 = vsel %vm1722_vm11, %v159_v48, %v153_v32  ;;  %v161_v52 = vsel %vm1722_vm11, %v157_v49, %v159_v48  ;;  %v162_v53 = vsel %vm1722_vm11, %v155_v40, %v157_v49  ;;  %vm1315_vm11 = vmand %vm1725_vm7, %vm1290_vm14  ;;  %vm1776_vm7 = vcmp.ge.s32.totalorder %v1207_v15, 1 }
  0x94   :  { %v165_v54 = vsel %vm1723_vm0, %v164_v51, 0.0  ;;  %v167_v55 = vsel %vm1726_vm9, %v162_v53, 0.0  ;;  %v168_v56 = vsel %vm1724_vm2, %v161_v52, 0.0  ;;  %v1771_v58 = vsel %vm1315_vm11, 4294967295, %v1770_v58  ;;  %vm1333_vm9 = vmand %vm1776_vm7, %vm1307_vm5  ;;  %v304_v22 = vld [vmem:[#allocation2] sm:$0xff]  ;;  %v307_v23 = vld [vmem:[#allocation2 + $0x18] sm:$0xff] }
  0x95   :  { %169 = vst [vmem:[#allocation2 + $0x20] sm:$0xf] %v165_v54  ;;  %171 = vst [vmem:[#allocation2 + $0x30] sm:$0xf] %v167_v55  ;;  %vm1319_vm0 = vcmp.le.s32.totalorder %v46_v26, 14  ;;  %vm1323_vm2 = vcmp.le.s32.totalorder %v47_v17, 14 }
  0x96   :  { %172 = vst [vmem:[#allocation2 + $0x38] sm:$0xf] %v168_v56  ;;  %v176_v60 = vpop.permute.xlu1 %175  ;;  %v174_v61 = vpop.permute.xlu0 %173  ;;  %vm1343_vm4 = vmand %vm1779_vm6, %vm1319_vm0  ;;  %vm1782_vm7 = vcmp.ge.s32.totalorder %v1210_v18, 1 }
  0x97   :  { %v184_v63 = vsel %vm1729_vm15, %v174_v61, %v176_v60  ;;  %vm1351_vm15 = vmand %vm1782_vm7, %vm1323_vm2  ;;  %vm1737_vm7 = vcmp.lt.s32.totalorder %v1197_v8, 113 }
  0x98   :  { %v187_v6 = vsel %vm1315_vm11, %v184_v63, 0.0  ;;  %v305_v9 = vld [vmem:[#allocation2 + $0x8] sm:$0xff]  ;;  %vm1785_vm11 = vcmp.lt.s32.totalorder %v1197_v8, 15 }
  0x99   :  { %v309_v10 = vld [vmem:[#allocation2 + $0x28] sm:$0xff]  ;;  %191 = vst [vmem:[#allocation2 + $0x48] sm:$0xf] %v187_v6  ;;  %vm1786_vm6 = vmmov %vm1785_vm11  ;;  %v306_v24 = vld [vmem:[#allocation2 + $0x10] sm:$0xff] }
  0x9a   :  { %v890_v12 = vpack.c.bf16 %v309_v10, %v305_v9  ;;  %v180_v13 = vpop.permute.xlu1 %179  ;;  %v178_v14 = vpop.permute.xlu0 %177  ;;  %vm1787_vm13 = vmmov %vm1786_vm6 }
  0x9b   :  { %v185_v16 = vsel %vm1785_vm11, %v180_v13, %v174_v61  ;;  %v182_v17 = vsel %vm1786_vm6, %v178_v14, %v180_v13  ;;  %v183_v19 = vsel %vm1787_vm13, %v176_v60, %v178_v14  ;;  %vm1733_vm11 = vcmp.lt.s32.totalorder %v1197_v8, 127 }
  0x9c   :  { %891 = vmatprep.subr.bf16.mxu0 %v890_v12  ;;  %v186_v26 = vsel %vm1333_vm9, %v185_v16, 0.0  ;;  %v188_v31 = vsel %vm1343_vm4, %v183_v19, 0.0  ;;  %v189_v32 = vsel %vm1351_vm15, %v182_v17, 0.0  ;;  %v308_v34 = vld [vmem:[#allocation2 + $0x20] sm:$0xff]  ;;  %v310_v36 = vld [vmem:[#allocation2 + $0x30] sm:$0xff]  ;;  %vm1735_vm13 = vcmp.le.s32.totalorder %v1207_v15, 14 }
  0x9d   :  { %v311_v35 = vld [vmem:[#allocation2 + $0x38] sm:$0xff]  ;;  %190 = vst [vmem:[#allocation2 + $0x40] sm:$0xf] %v186_v26  ;;  %192 = vst [vmem:[#allocation2 + $0x50] sm:$0xf] %v188_v31  ;;  %v892_v37 = vpack.c.bf16 %v308_v34, %v304_v22  ;;  %v908_v41 = vpack.c.bf16 %v310_v36, %v306_v24 }
  0x9e   :  { %193 = vst [vmem:[#allocation2 + $0x58] sm:$0xf] %v189_v32  ;;  %v906_v40 = vpack.c.bf16 %v311_v35, %v307_v23  ;;  %v197_v42 = vpop.permute.xlu1 %196  ;;  %v195_v43 = vpop.permute.xlu0 %194  ;;  %v1788_v35 = vmov 0 }
  0x9f   :  { %v205_v44 = vsel %vm1734_vm12, %v195_v43, %v197_v42  ;;  %893 = vmatpush1.bf16.msra.mxu0 %v892_v37 }
  0xa0   :  { %907 = vmatprep.subr.bf16.mxu1 %v906_v40  ;;  %v208_v45 = vsel %vm1244_vm8, %v205_v44, 0.0  ;;  %v313_v63 = vld [vmem:[#allocation2 + $0x48] sm:$0xff]  ;;  %v1791_v44 = vmov 0 }
  0xa1   :  { %909 = vmatpush1.bf16.msra.mxu1 %v908_v41  ;;  %212 = vst [vmem:[#allocation2 + $0x68] sm:$0xf] %v208_v45 }
  0xa2   :  { %v201_v46 = vpop.permute.xlu1 %200  ;;  %v199_v47 = vpop.permute.xlu0 %198 }
  0xa3   :  { %v206_v48 = vsel %vm1734_vm12, %v201_v46, %v195_v43  ;;  %v203_v49 = vsel %vm1734_vm12, %v199_v47, %v201_v46  ;;  %v204_v51 = vsel %vm1734_vm12, %v197_v42, %v199_v47  ;;  %vm1739_vm12 = vcmp.le.s32.totalorder %v1217_v21, 14 }
  0xa4   :  { %v207_v52 = vsel %vm1213_vm1, %v206_v48, 0.0  ;;  %v209_v53 = vsel %vm1249_vm10, %v204_v51, 0.0  ;;  %v210_v54 = vsel %vm1220_vm3, %v203_v49, 0.0  ;;  %v312_v17 = vld [vmem:[#allocation2 + $0x40] sm:$0xff]  ;;  %v314_v22 = vld [vmem:[#allocation2 + $0x50] sm:$0xff]  ;;  %vm1430_vm6 = vmand %vm1739_vm12, %vm1244_vm8  ;;  %v1796_v47 = vmov 0 }
  0xa5   :  { %211 = vst [vmem:[#allocation2 + $0x60] sm:$0xf] %v207_v52  ;;  %213 = vst [vmem:[#allocation2 + $0x70] sm:$0xf] %v209_v53  ;;  %v315_v19 = vld [vmem:[#allocation2 + $0x58] sm:$0xff]  ;;  %v321_v51 = vld [vmem:[#allocation2 + $0x88] sm:$0xff] }
  0xa6   :  { %214 = vst [vmem:[#allocation2 + $0x78] sm:$0xf] %v210_v54  ;;  %v222_v55 = vpop.permute.xlu1 %221  ;;  %v220_v56 = vpop.permute.xlu0 %219  ;;  %v323_v52 = vld [vmem:[#allocation2 + $0x98] sm:$0xff]  ;;  %v322_v53 = vld [vmem:[#allocation2 + $0x90] sm:$0xff]  ;;  %vm1744_vm8 = vcmp.lt.s32.totalorder %v1197_v8, 112 }
  0xa7   :  { %v230_v60 = vsel %vm1733_vm11, %v220_v56, %v222_v55 }
  0xa8   :  { %v232_v61 = vsel %vm1307_vm5, %v230_v60, 0.0  ;;  %v317_v6 = vld [vmem:[#allocation2 + $0x68] sm:$0xff]  ;;  %v320_v60 = vld [vmem:[#allocation2 + $0x80] sm:$0xff] }
  0xa9   :  { %236 = vst [vmem:[#allocation2 + $0xa0] sm:$0xf] %v232_v61  ;;  %v894_v9 = vpack.c.bf16 %v317_v6, %v313_v63 }
  0xaa   :  { %v226_v10 = vpop.permute.xlu1 %225  ;;  %v224_v12 = vpop.permute.xlu0 %223 }
  0xab   :  { %v231_v13 = vsel %vm1733_vm11, %v226_v10, %v220_v56  ;;  %v228_v14 = vsel %vm1733_vm11, %v224_v12, %v226_v10  ;;  %v229_v16 = vsel %vm1733_vm11, %v222_v55, %v224_v12  ;;  %895 = vmatprep.subr.bf16.mxu0 %v894_v9  ;;  %vm1408_vm11 = vmand %vm1735_vm13, %vm1213_vm1  ;;  %vm1790_vm13 = vcmp.le.s32.totalorder %v1210_v18, 14 }
  0xac   :  { %v235_v23 = vsel %vm1323_vm2, %v231_v13, 0.0  ;;  %v233_v24 = vsel %vm1290_vm14, %v229_v16, 0.0  ;;  %v234_v26 = vsel %vm1319_vm0, %v228_v14, 0.0  ;;  %v316_v31 = vld [vmem:[#allocation2 + $0x60] sm:$0xff]  ;;  %v318_v34 = vld [vmem:[#allocation2 + $0x70] sm:$0xff]  ;;  %v1789_v35 = vsel %vm1408_vm11, 4294967295, %v1788_v35  ;;  %vm1420_vm1 = vmand %vm1790_vm13, %vm1220_vm3 }
  0xad   :  { %v319_v32 = vld [vmem:[#allocation2 + $0x78] sm:$0xff]  ;;  %239 = vst [vmem:[#allocation2 + $0xb8] sm:$0xf] %v235_v23  ;;  %237 = vst [vmem:[#allocation2 + $0xa8] sm:$0xf] %v233_v24  ;;  %v896_v36 = vpack.c.bf16 %v316_v31, %v312_v17  ;;  %v912_v40 = vpack.c.bf16 %v318_v34, %v314_v22  ;;  %v1792_v44 = vsel %vm1420_vm1, 4294967295, %v1791_v44 }
  0xae   :  { %238 = vst [vmem:[#allocation2 + $0xb0] sm:$0xf] %v234_v26  ;;  %v910_v37 = vpack.c.bf16 %v319_v32, %v315_v19  ;;  %v243_v41 = vpop.permute.xlu1 %242  ;;  %v241_v42 = vpop.permute.xlu0 %240  ;;  %vm1795_vm13 = vcmp.le.s32.totalorder %v1224_v27, 14 }
  0xaf   :  { %v251_v43 = vsel %vm1737_vm7, %v241_v42, %v243_v41  ;;  %897 = vmatpush1.bf16.msra.mxu0 %v896_v36  ;;  %vm1438_vm7 = vmand %vm1795_vm13, %vm1249_vm10 }
  0xb0   :  { %911 = vmatprep.subr.bf16.mxu1 %v910_v37  ;;  %v253_v45 = vsel %vm1408_vm11, %v251_v43, 0.0  ;;  %v1797_v47 = vsel %vm1438_vm7, 4294967295, %v1796_v47  ;;  %vm1798_vm11 = vcmp.lt.s32.totalorder %v1197_v8, 113  ;;  %v324_v61 = vld [vmem:[#allocation2 + $0xa0] sm:$0xff] }
  0xb1   :  { %913 = vmatpush1.bf16.msra.mxu1 %v912_v40  ;;  %257 = vst [vmem:[#allocation2 + $0xc0] sm:$0xf] %v253_v45  ;;  %vm1799_vm12 = vmmov %vm1798_vm11  ;;  %v900_v23 = vpack.c.bf16 %v324_v61, %v320_v60 }
  0xb2   :  { %v247_v48 = vpop.permute.xlu1 %246  ;;  %v245_v49 = vpop.permute.xlu0 %244  ;;  %vm1800_vm3 = vmmov %vm1798_vm11 }
  0xb3   :  { %v252_v54 = vsel %vm1798_vm11, %v247_v48, %v241_v42  ;;  %v249_v55 = vsel %vm1799_vm12, %v245_v49, %v247_v48  ;;  %v250_v56 = vsel %vm1800_vm3, %v243_v41, %v245_v49  ;;  %vm1801_vm3 = vcmp.le.s32.totalorder %v1207_v15, 14 }
  0xb4   :  { %v256_v63 = vsel %vm1420_vm1, %v252_v54, 0.0  ;;  %v254_v6 = vsel %vm1430_vm6, %v250_v56, 0.0  ;;  %v255_v9 = vsel %vm1438_vm7, %v249_v55, 0.0  ;;  %v325_v10 = vld [vmem:[#allocation2 + $0xa8] sm:$0xff]  ;;  %v327_v12 = vld [vmem:[#allocation2 + $0xb8] sm:$0xff]  ;;  %vm1802_vm12 = vcmp.le.s32.totalorder %v1210_v18, 14 }
  0xb5   :  { %v326_v13 = vld [vmem:[#allocation2 + $0xb0] sm:$0xff]  ;;  %260 = vst [vmem:[#allocation2 + $0xd8] sm:$0xf] %v256_v63  ;;  %258 = vst [vmem:[#allocation2 + $0xc8] sm:$0xf] %v254_v6  ;;  %v898_v14 = vpack.c.bf16 %v325_v10, %v321_v51  ;;  %v914_v16 = vpack.c.bf16 %v327_v12, %v323_v52  ;;  %vm1803_vm11 = vcmp.le.s32.totalorder %v1217_v21, 14 }
  0xb6   :  { %259 = vst [vmem:[#allocation2 + $0xd0] sm:$0xf] %v255_v9  ;;  %v916_v17 = vpack.c.bf16 %v326_v13, %v322_v53  ;;  %v264_v19 = vpop.permute.xlu1 %263  ;;  %v262_v22 = vpop.permute.xlu0 %261  ;;  %vm1804_vm1 = vcmp.le.s32.totalorder %v1207_v15, 14  ;;  %v1807_v51 = vmov 0  ;;  %v1810_v53 = vmov 0 }
  0xb7   :  { %v272_v24 = vsel %vm1744_vm8, %v262_v22, %v264_v19  ;;  %899 = vmatprep.subr.bf16.mxu0 %v898_v14  ;;  %915 = vmatprep.subr.bf16.mxu1 %v914_v16  ;;  %vm1476_vm7 = vmand %vm1804_vm1, %vm1307_vm5  ;;  %vm1809_vm1 = vcmp.le.s32.totalorder %v1217_v21, 14  ;;  %v1813_v54 = vmov 0 }
  0xb8   :  { %v274_v26 = vsel %vm1801_vm3, %v272_v24, 0.0  ;;  %901 = vmatpush1.bf16.msra.mxu0 %v900_v23  ;;  %917 = vmatpush1.bf16.msra.mxu1 %v916_v17  ;;  %vm1745_vm3 = vcmp.lt.s32.totalorder %v1197_v8, 111 }
  0xb9   :  { %278 = vst [vmem:[#allocation2 + $0xe0] sm:$0xf] %v274_v26  ;;  %v328_v26 = vld [vmem:[#allocation2 + $0xc0] sm:$0xff] }
  0xba   :  { %v268_v31 = vpop.permute.xlu1 %267  ;;  %v266_v32 = vpop.permute.xlu0 %265 }
  0xbb   :  { %v273_v34 = vsel %vm1744_vm8, %v268_v31, %v262_v22  ;;  %v270_v36 = vsel %vm1744_vm8, %v266_v32, %v268_v31  ;;  %v271_v37 = vsel %vm1744_vm8, %v264_v19, %v266_v32  ;;  %vm1812_vm8 = vcmp.le.s32.totalorder %v1224_v27, 14 }
  0xbc   :  { %v277_v40 = vsel %vm1802_vm12, %v273_v34, 0.0  ;;  %v275_v41 = vsel %vm1803_vm11, %v271_v37, 0.0  ;;  %v276_v42 = vsel %vm1795_vm13, %v270_v36, 0.0  ;;  %vm1486_vm11 = vmand %vm1802_vm12, %vm1323_vm2  ;;  %v329_v60 = vld [vmem:[#allocation2 + $0xc8] sm:$0xff]  ;;  %v331_v9 = vld [vmem:[#allocation2 + $0xd8] sm:$0xff] }
  0xbd   :  { %281 = vst [vmem:[#allocation2 + $0xf8] sm:$0xf] %v277_v40  ;;  %279 = vst [vmem:[#allocation2 + $0xe8] sm:$0xf] %v275_v41  ;;  %v1808_v51 = vsel %vm1486_vm11, 4294967295, %v1807_v51  ;;  %v330_v12 = vld [vmem:[#allocation2 + $0xd0] sm:$0xff] }
  0xbe   :  { %280 = vst [vmem:[#allocation2 + $0xf0] sm:$0xf] %v276_v42  ;;  %v285_v45 = vpop.permute.xlu1 %284  ;;  %v283_v48 = vpop.permute.xlu0 %282  ;;  %vm1496_vm13 = vmand %vm1809_vm1, %vm1290_vm14  ;;  %v303_v34 = vld [vmem:[%s1715_s1] sm:$0xf] }
  0xbf   :  { %v293_v49 = vsel %vm1745_vm3, %v283_v48, %v285_v45  ;;  %v1811_v53 = vsel %vm1496_vm13, 4294967295, %v1810_v53  ;;  %vm1504_vm12 = vmand %vm1812_vm8, %vm1319_vm0  ;;  %vm1746_vm8 = vcmask 588800  }
  0xc0   :  { %v295_v52 = vsel %vm1476_vm7, %v293_v49, 0.0  ;;  %v1814_v54 = vsel %vm1504_vm12, 4294967295, %v1813_v54  ;;  %v332_v10 = vld [vmem:[#allocation2 + $0xe0] sm:$0xff]  ;;  %v496_v49 = vstv %s1719_s5 }
  0xc1   :  { %299 = vst [vmem:[#allocation2 + $0x100] sm:$0xf] %v295_v52  ;;  %v904_v32 = vpack.c.bf16 %v332_v10, %v328_v26 }
  0xc2   :  { %v289_v55 = vpop.permute.xlu1 %288  ;;  %v287_v56 = vpop.permute.xlu0 %286 }
  0xc3   :  { %v294_v61 = vsel %vm1745_vm3, %v289_v55, %v283_v48  ;;  %v291_v63 = vsel %vm1745_vm3, %v287_v56, %v289_v55  ;;  %v292_v6 = vsel %vm1745_vm3, %v285_v45, %v287_v56 }
  0xc4   :  { %v298_v13 = vsel %vm1486_vm11, %v294_v61, 0.0  ;;  %v296_v14 = vsel %vm1496_vm13, %v292_v6, 0.0  ;;  %v297_v16 = vsel %vm1504_vm12, %v291_v63, 0.0  ;;  %v333_v17 = vld [vmem:[#allocation2 + $0xe8] sm:$0xff]  ;;  %v335_v19 = vld [vmem:[#allocation2 + $0xf8] sm:$0xff] }
  0xc5   :  { %v334_v22 = vld [vmem:[#allocation2 + $0xf0] sm:$0xff]  ;;  %302 = vst [vmem:[#allocation2 + $0x118] sm:$0xf] %v298_v13  ;;  %300 = vst [vmem:[#allocation2 + $0x108] sm:$0xf] %v296_v14  ;;  %v902_v23 = vpack.c.bf16 %v333_v17, %v329_v60  ;;  %v918_v24 = vpack.c.bf16 %v335_v19, %v331_v9 }
  0xc6   :  { %301 = vst [vmem:[#allocation2 + $0x110] sm:$0xf] %v297_v16  ;;  %v920_v31 = vpack.c.bf16 %v334_v22, %v330_v12  ;;  %v706_v17 = vld [vmem:[%s1718_s4] sm:$0xf] }
  0xc7   :  { %903 = vmatprep.subr.bf16.mxu0 %v902_v23  ;;  %919 = vmatprep.subr.bf16.mxu1 %v918_v24 }
  0xc8   :  { %905 = vmatpush1.bf16.msra.mxu0 %v904_v32  ;;  %921 = vmatpush1.bf16.msra.mxu1 %v920_v31  ;;  %v336_v41 = vld [vmem:[#allocation2 + $0x100] sm:$0xff] }
  0xcc   :  { %v337_v36 = vld [vmem:[#allocation2 + $0x108] sm:$0xff]  ;;  %v339_v37 = vld [vmem:[#allocation2 + $0x118] sm:$0xff] }
  0xcd   :  { %v338_v40 = vld [vmem:[#allocation2 + $0x110] sm:$0xff]  ;;  %366 = vmatprep.subr.mxu0 %v337_v36  ;;  %437 = vmatprep.subr.mxu1 %v339_v37 }
  0xce   :  { %367 = vmatpush1.msra.mxu0 %v336_v41  ;;  %438 = vmatpush1.msra.mxu1 %v338_v40 }
  0xcf   :  { %886 = vmatmul.mubr.msk.f32.vlgmr.msra.gmra.mrb[0].mxu0 %vm1746_vm8, %v303_v34  ;;  %887 = vmatmul.mubr.msk.f32.vlgmr.msra.gmra.mrb[0].mxu1 %vm1746_vm8, %v303_v34 }
  0xd0   :  { %779 = vmatprep.mubr.f32.mxu0 %v1018_v0  ;;  %850 = vmatprep.mubr.f32.mxu1 %v1018_v0 }
  0xd3   :  { %v344_v42 = vpop.permute.xlu0 %343 }
 0x1a2   :  { %v487_v45 = vpop.f32.mrb[0].mxu1  ;;  %v416_v48 = vpop.f32.mrb[0].mxu0 }
 0x1a3   :  { %v488_v52 = vadd.f32 %v487_v45, %v344_v42  ;;  %v417_v55 = vadd.f32 %v416_v48, %v344_v42  ;;  %v418_v56 = vpop.f32.mrb[1].mxu0  ;;  %v489_v60 = vpop.f32.mrb[1].mxu1 }
 0x1a4   :  { %v419_v61 = vadd.f32 %v418_v56, %v344_v42  ;;  %v490_v63 = vadd.f32 %v489_v60, %v344_v42 }
 0x1a5   :  { %vm494_vm1 = vcmp.gt.f32.partialorder %v488_v52, 0.0  ;;  %vm492_vm3 = vcmp.gt.f32.partialorder %v417_v55, 0.0  ;;  %v497_v6 = vmul.f32 %v496_v49, %v417_v55  ;;  %v499_v9 = vmul.f32 %v496_v49, %v488_v52 }
 0x1a6   :  { %vm493_vm8 = vcmp.gt.f32.partialorder %v419_v61, 0.0  ;;  %v498_v10 = vmul.f32 %v496_v49, %v419_v61  ;;  %vm495_vm11 = vcmp.gt.f32.partialorder %v490_v63, 0.0  ;;  %v500_v0 = vmul.f32 %v496_v49, %v490_v63 }
 0x1a7   :  { %v501_v12 = vsel %vm492_vm3, %v417_v55, %v497_v6  ;;  %v503_v13 = vsel %vm494_vm1, %v488_v52, %v499_v9  ;;  %vm1815_vm3 = vcmp.lt.s32.totalorder %v1197_v8, 17  ;;  %vm1818_vm1 = vnez %v1765_v39 }
 0x1a8   :  { %585 = vst [vmem:[#allocation2 + $0x80] sm:$0xf] %v501_v12  ;;  %587 = vst [vmem:[#allocation2 + $0x90] sm:$0xf] %v503_v13  ;;  %v502_v14 = vsel %vm493_vm8, %v419_v61, %v498_v10  ;;  %v504_v16 = vsel %vm495_vm11, %v490_v63, %v500_v0  ;;  %509 = vrot.lane.b32.xlu0 %v503_v13, %s1019_s0  ;;  %505 = vrot.lane.b32.xlu1 %v501_v12, %s1019_s0  ;;  %vm1817_vm8 = vnez %v1763_v38 }
 0x1a9   :  { %586 = vst [vmem:[#allocation2 + $0x88] sm:$0xf] %v502_v14  ;;  %588 = vst [vmem:[#allocation2 + $0x98] sm:$0xf] %v504_v16 }
 0x1aa   :  { %vm1816_vm11 = vmmov %vm1815_vm3 }
 0x1ab   :  { %vm1819_vm12 = vmmov %vm1815_vm3 }
 0x1ac   :  { %525 = vrot.lane.b32.xlu0 %v501_v12, %s1020_s9  ;;  %507 = vrot.lane.b32.xlu1 %v502_v14, %s1019_s0  ;;  %vm1820_vm13 = vmmov %vm1815_vm3 }
 0x1af   :  { %v686_v62 = vld [vmem:[#allocation2 + $0x80] sm:$0xff] }
 0x1b0   :  { %529 = vrot.lane.b32.xlu0 %v503_v13, %s1020_s9  ;;  %511 = vrot.lane.b32.xlu1 %v504_v16, %s1019_s0 }
 0x1b4   :  { %545 = vrot.lane.b32.xlu0 %v501_v12, %s1021_s10  ;;  %527 = vrot.lane.b32.xlu1 %v502_v14, %s1020_s9 }
 0x1b8   :  { %549 = vrot.lane.b32.xlu0 %v503_v13, %s1021_s10  ;;  %531 = vrot.lane.b32.xlu1 %v504_v16, %s1020_s9 }
 0x1bc   :  { %565 = vrot.lane.b32.xlu0 %v501_v12, %s1022_s11  ;;  %547 = vrot.lane.b32.xlu1 %v502_v14, %s1021_s10 }
 0x1c0   :  { %569 = vrot.lane.b32.xlu0 %v503_v13, %s1022_s11  ;;  %551 = vrot.lane.b32.xlu1 %v504_v16, %s1021_s10 }
 0x1c4   :  { %589 = vrot.lane.b32.xlu0 %v501_v12, %s1023_s12  ;;  %567 = vrot.lane.b32.xlu1 %v502_v14, %s1022_s11 }
 0x1c8   :  { %593 = vrot.lane.b32.xlu0 %v503_v13, %s1023_s12  ;;  %571 = vrot.lane.b32.xlu1 %v504_v16, %s1022_s11 }
 0x1cc   :  { %609 = vrot.lane.b32.xlu0 %v501_v12, %s1024_s13  ;;  %591 = vrot.lane.b32.xlu1 %v502_v14, %s1023_s12 }
 0x1d0   :  { %613 = vrot.lane.b32.xlu0 %v503_v13, %s1024_s13  ;;  %595 = vrot.lane.b32.xlu1 %v504_v16, %s1023_s12 }
 0x1d4   :  { %629 = vrot.lane.b32.xlu0 %v501_v12, %s1025_s14  ;;  %611 = vrot.lane.b32.xlu1 %v502_v14, %s1024_s13 }
 0x1d8   :  { %633 = vrot.lane.b32.xlu0 %v503_v13, %s1025_s14  ;;  %615 = vrot.lane.b32.xlu1 %v504_v16, %s1024_s13 }
 0x1dc   :  { %649 = vrot.lane.b32.xlu0 %v501_v12, %s1026_s15  ;;  %631 = vrot.lane.b32.xlu1 %v502_v14, %s1025_s14 }
 0x1e0   :  { %653 = vrot.lane.b32.xlu0 %v503_v13, %s1026_s15  ;;  %635 = vrot.lane.b32.xlu1 %v504_v16, %s1025_s14 }
 0x1e4   :  { %709 = vperm.xlu0 %966, %v706_v17   ;;  %651 = vrot.lane.b32.xlu1 %v502_v14, %s1026_s15 }
 0x1e8   :  { %655 = vrot.lane.b32.xlu1 %v504_v16, %s1026_s15 }
 0x21a   :  { %v510_v19 = vpop.permute.xlu0 %509  ;;  %v506_v22 = vpop.permute.xlu1 %505 }
 0x21e   :  { %v526_v23 = vpop.permute.xlu0 %525  ;;  %v508_v24 = vpop.permute.xlu1 %507 }
 0x21f   :  { %v514_v26 = vsel %vm1815_vm3, %v508_v24, %v510_v19  ;;  %v515_v31 = vsel %vm1816_vm11, %v506_v22, %v508_v24  ;;  %vm1821_vm3 = vnez %v1755_v28  ;;  %vm1822_vm11 = vnez %v1757_v29 }
 0x220   :  { %v518_v32 = vsel %vm1817_vm8, %v515_v31, 0.0  ;;  %v519_v34 = vsel %vm1818_vm1, %v514_v26, 0.0  ;;  %vm1823_vm8 = vcmp.lt.s32.totalorder %v1197_v8, 16 }
 0x221   :  { %522 = vst [vmem:[#allocation2 + $0x8] sm:$0xf] %v518_v32  ;;  %523 = vst [vmem:[#allocation2 + $0x10] sm:$0xf] %v519_v34 }
 0x222   :  { %v530_v36 = vpop.permute.xlu0 %529  ;;  %v512_v37 = vpop.permute.xlu1 %511  ;;  %vm1824_vm1 = vmmov %vm1823_vm8 }
 0x223   :  { %v513_v40 = vsel %vm1819_vm12, %v510_v19, %v512_v37  ;;  %v516_v41 = vsel %vm1820_vm13, %v512_v37, %v506_v22  ;;  %vm1825_vm12 = vcmp.ge.s32.totalorder %v1217_v21, 1  ;;  %vm1826_vm13 = vcmp.ge.s32.totalorder %v1224_v27, 1 }
 0x224   :  { %v517_v42 = vsel %vm1821_vm3, %v516_v41, 0.0  ;;  %v520_v38 = vsel %vm1822_vm11, %v513_v40, 0.0  ;;  %vm1827_vm3 = vmmov %vm1824_vm1 }
 0x225   :  { %521 = vst [vmem:[#allocation2] sm:$0xf] %v517_v42  ;;  %524 = vst [vmem:[#allocation2 + $0x18] sm:$0xf] %v520_v38 }
 0x226   :  { %v546_v39 = vpop.permute.xlu0 %545  ;;  %v528_v45 = vpop.permute.xlu1 %527  ;;  %vm1828_vm11 = vmmov %vm1824_vm1 }
 0x227   :  { %v534_v48 = vsel %vm1823_vm8, %v528_v45, %v530_v36  ;;  %v535_v49 = vsel %vm1824_vm1, %v526_v23, %v528_v45  ;;  %vm1829_vm8 = vcmp.ge.s32.totalorder %v1207_v15, 1  ;;  %vm1830_vm1 = vcmp.ge.s32.totalorder %v1210_v18, 1 }
 0x228   :  { %v538_v52 = vsel %vm1825_vm12, %v535_v49, 0.0  ;;  %v539_v28 = vsel %vm1826_vm13, %v534_v48, 0.0  ;;  %vm1831_vm12 = vcmp.lt.s32.totalorder %v1197_v8, 15  ;;  %v671_v14 = vld [vmem:[#allocation2 + $0x8] sm:$0xff]  ;;  %v672_v41 = vld [vmem:[#allocation2 + $0x10] sm:$0xff] }
 0x229   :  { %542 = vst [vmem:[#allocation2 + $0x28] sm:$0xf] %v538_v52  ;;  %543 = vst [vmem:[#allocation2 + $0x30] sm:$0xf] %v539_v28 }
 0x22a   :  { %v550_v29 = vpop.permute.xlu0 %549  ;;  %v532_v55 = vpop.permute.xlu1 %531  ;;  %vm1832_vm13 = vmmov %vm1831_vm12 }
 0x22b   :  { %v533_v56 = vsel %vm1827_vm3, %v530_v36, %v532_v55  ;;  %v536_v60 = vsel %vm1828_vm11, %v532_v55, %v526_v23  ;;  %vm1833_vm3 = vnez %v1771_v58  ;;  %vm1834_vm11 = vmmov %vm1831_vm12 }
 0x22c   :  { %v537_v61 = vsel %vm1829_vm8, %v536_v60, 0.0  ;;  %v540_v63 = vsel %vm1830_vm1, %v533_v56, 0.0  ;;  %vm1835_vm8 = vmmov %vm1834_vm11  ;;  %v670_v26 = vld [vmem:[#allocation2] sm:$0xff]  ;;  %v673_v34 = vld [vmem:[#allocation2 + $0x18] sm:$0xff] }
 0x22d   :  { %541 = vst [vmem:[#allocation2 + $0x20] sm:$0xf] %v537_v61  ;;  %544 = vst [vmem:[#allocation2 + $0x38] sm:$0xf] %v540_v63 }
 0x22e   :  { %v566_v6 = vpop.permute.xlu0 %565  ;;  %v548_v9 = vpop.permute.xlu1 %547 }
 0x22f   :  { %v554_v10 = vsel %vm1831_vm12, %v548_v9, %v550_v29  ;;  %v555_v0 = vsel %vm1832_vm13, %v546_v39, %v548_v9  ;;  %vm1841_vm13 = vnez %v1751_v20 }
 0x230   :  { %v558_v12 = vsel %vm1833_vm3, %v555_v0, 0.0  ;;  %v559_v13 = vsel %vm1343_vm4, %v554_v10, 0.0  ;;  %v675_v16 = vld [vmem:[#allocation2 + $0x28] sm:$0xff]  ;;  %v676_v58 = vld [vmem:[#allocation2 + $0x30] sm:$0xff]  ;;  %vm1836_vm4 = vcmp.lt.s32.totalorder %v1197_v8, 1  ;;  %vm1842_vm3 = vnez %v1753_v25 }
 0x231   :  { %562 = vst [vmem:[#allocation2 + $0x48] sm:$0xf] %v558_v12  ;;  %563 = vst [vmem:[#allocation2 + $0x50] sm:$0xf] %v559_v13  ;;  %v922_v17 = vpack.c.bf16 %v675_v16, %v671_v14 }
 0x232   :  { %v570_v19 = vpop.permute.xlu0 %569  ;;  %v552_v22 = vpop.permute.xlu1 %551  ;;  %vm1837_vm1 = vmmov %vm1836_vm4 }
 0x233   :  { %v553_v23 = vsel %vm1834_vm11, %v550_v29, %v552_v22  ;;  %v556_v24 = vsel %vm1835_vm8, %v552_v22, %v546_v39  ;;  %923 = vmatprep.subr.bf16.mxu0 %v922_v17  ;;  %v940_v39 = vpack.c.bf16 %v676_v58, %v672_v41  ;;  %vm1840_vm12 = vmmov %vm1837_vm1 }
 0x234   :  { %v557_v7 = vsel %vm1333_vm9, %v556_v24, 0.0  ;;  %v560_v31 = vsel %vm1351_vm15, %v553_v23, 0.0  ;;  %v674_v32 = vld [vmem:[#allocation2 + $0x20] sm:$0xff]  ;;  %v677_v36 = vld [vmem:[#allocation2 + $0x38] sm:$0xff]  ;;  %vm1838_vm9 = vnez %v1759_v30  ;;  %vm1839_vm15 = vmmov %vm1837_vm1 }
 0x235   :  { %561 = vst [vmem:[#allocation2 + $0x40] sm:$0xf] %v557_v7  ;;  %564 = vst [vmem:[#allocation2 + $0x58] sm:$0xf] %v560_v31  ;;  %v924_v37 = vpack.c.bf16 %v674_v32, %v670_v26  ;;  %v938_v40 = vpack.c.bf16 %v677_v36, %v673_v34 }
 0x236   :  { %v590_v42 = vpop.permute.xlu0 %589  ;;  %v568_v38 = vpop.permute.xlu1 %567 }
 0x237   :  { %v574_v45 = vsel %vm1836_vm4, %v568_v38, %v570_v19  ;;  %v575_v5 = vsel %vm1837_vm1, %v566_v6, %v568_v38  ;;  %925 = vmatpush1.bf16.msra.mxu0 %v924_v37  ;;  %939 = vmatprep.subr.bf16.mxu1 %v938_v40  ;;  %v687_v37 = vld [vmem:[#allocation2 + $0x88] sm:$0xff] }
 0x238   :  { %v578_v11 = vsel %vm1838_vm9, %v575_v5, 0.0  ;;  %v579_v48 = vsel %vm1249_vm10, %v574_v45, 0.0  ;;  %941 = vmatpush1.bf16.msra.mxu1 %v940_v39  ;;  %vm1843_vm10 = vcmp.lt.s32.totalorder %v1197_v8, 127  ;;  %v680_v26 = vld [vmem:[#allocation2 + $0x50] sm:$0xff]  ;;  %vm1853_vm9 = vnez %v1792_v44 }
 0x239   :  { %582 = vst [vmem:[#allocation2 + $0x68] sm:$0xf] %v578_v11  ;;  %583 = vst [vmem:[#allocation2 + $0x70] sm:$0xf] %v579_v48  ;;  %v688_v11 = vld [vmem:[#allocation2 + $0x90] sm:$0xff] }
 0x23a   :  { %v594_v49 = vpop.permute.xlu0 %593  ;;  %v572_v52 = vpop.permute.xlu1 %571  ;;  %vm1844_vm11 = vmmov %vm1843_vm10 }
 0x23b   :  { %v573_v28 = vsel %vm1839_vm15, %v570_v19, %v572_v52  ;;  %v576_v29 = vsel %vm1840_vm12, %v572_v52, %v566_v6  ;;  %v679_v6 = vld [vmem:[#allocation2 + $0x48] sm:$0xff]  ;;  %vm1845_vm8 = vmmov %vm1843_vm10  ;;  %vm1854_vm15 = vcmp.lt.s32.totalorder %v1197_v8, 112 }
 0x23c   :  { %v577_v55 = vsel %vm1841_vm13, %v576_v29, 0.0  ;;  %v580_v30 = vsel %vm1842_vm3, %v573_v28, 0.0  ;;  %vm1846_vm4 = vmmov %vm1845_vm8  ;;  %v678_v14 = vld [vmem:[#allocation2 + $0x40] sm:$0xff]  ;;  %v681_v19 = vld [vmem:[#allocation2 + $0x58] sm:$0xff]  ;;  %vm1856_vm13 = vcmp.le.s32.totalorder %v1207_v15, 14  ;;  %vm1857_vm3 = vcmp.le.s32.totalorder %v1217_v21, 14 }
 0x23d   :  { %581 = vst [vmem:[#allocation2 + $0x60] sm:$0xf] %v577_v55  ;;  %584 = vst [vmem:[#allocation2 + $0x78] sm:$0xf] %v580_v30 }
 0x23e   :  { %v610_v33 = vpop.permute.xlu0 %609  ;;  %v592_v56 = vpop.permute.xlu1 %591  ;;  %vm1855_vm12 = vmmov %vm1854_vm15 }
 0x23f   :  { %v598_v60 = vsel %vm1843_vm10, %v592_v56, %v594_v49  ;;  %v599_v61 = vsel %vm1844_vm11, %v590_v42, %v592_v56  ;;  %vm1858_vm10 = vmmov %vm1855_vm12 }
 0x240   :  { %v601_v63 = vsel %vm1307_vm5, %v599_v61, 0.0  ;;  %v602_v20 = vsel %vm1290_vm14, %v598_v60, 0.0  ;;  %v683_v9 = vld [vmem:[#allocation2 + $0x68] sm:$0xff]  ;;  %v684_v57 = vld [vmem:[#allocation2 + $0x70] sm:$0xff]  ;;  %vm1847_vm5 = vcmp.lt.s32.totalorder %v1197_v8, 113  ;;  %vm1859_vm11 = vmmov %vm1858_vm10 }
 0x241   :  { %605 = vst [vmem:[#allocation2 + $0xa0] sm:$0xf] %v601_v63  ;;  %606 = vst [vmem:[#allocation2 + $0xa8] sm:$0xf] %v602_v20  ;;  %v926_v25 = vpack.c.bf16 %v683_v9, %v679_v6  ;;  %v944_v31 = vpack.c.bf16 %v684_v57, %v680_v26 }
 0x242   :  { %v614_v10 = vpop.permute.xlu0 %613  ;;  %v596_v0 = vpop.permute.xlu1 %595  ;;  %vm1848_vm14 = vmmov %vm1847_vm5 }
 0x243   :  { %v597_v12 = vsel %vm1845_vm8, %v594_v49, %v596_v0  ;;  %v600_v13 = vsel %vm1846_vm4, %v596_v0, %v590_v42  ;;  %927 = vmatprep.subr.bf16.mxu0 %v926_v25  ;;  %v689_v49 = vld [vmem:[#allocation2 + $0x98] sm:$0xff]  ;;  %vm1860_vm8 = vcmp.le.s32.totalorder %v1224_v27, 14  ;;  %vm1861_vm4 = vcmp.le.s32.totalorder %v1210_v18, 14 }
 0x244   :  { %v603_v50 = vsel %vm1319_vm0, %v597_v12, 0.0  ;;  %v604_v16 = vsel %vm1323_vm2, %v600_v13, 0.0  ;;  %v682_v17 = vld [vmem:[#allocation2 + $0x60] sm:$0xff]  ;;  %v685_v22 = vld [vmem:[#allocation2 + $0x78] sm:$0xff]  ;;  %vm1849_vm0 = vnez %v1789_v35  ;;  %vm1850_vm2 = vmmov %vm1847_vm5 }
 0x245   :  { %607 = vst [vmem:[#allocation2 + $0xb0] sm:$0xf] %v603_v50  ;;  %608 = vst [vmem:[#allocation2 + $0xb8] sm:$0xf] %v604_v16  ;;  %v928_v23 = vpack.c.bf16 %v682_v17, %v678_v14  ;;  %v942_v24 = vpack.c.bf16 %v685_v22, %v681_v19 }
 0x246   :  { %v630_v58 = vpop.permute.xlu0 %629  ;;  %v612_v7 = vpop.permute.xlu1 %611  ;;  %vm1851_vm1 = vmmov %vm1850_vm2 }
 0x247   :  { %v618_v32 = vsel %vm1847_vm5, %v612_v7, %v614_v10  ;;  %v619_v59 = vsel %vm1848_vm14, %v610_v33, %v612_v7  ;;  %929 = vmatpush1.bf16.msra.mxu0 %v928_v23  ;;  %943 = vmatprep.subr.bf16.mxu1 %v942_v24  ;;  %vm1862_vm5 = vcmp.lt.s32.totalorder %v1197_v8, 111 }
 0x248   :  { %v621_v34 = vsel %vm1849_vm0, %v619_v59, 0.0  ;;  %v622_v36 = vsel %vm1430_vm6, %v618_v32, 0.0  ;;  %945 = vmatpush1.bf16.msra.mxu1 %v944_v31  ;;  %v691_v40 = vld [vmem:[#allocation2 + $0xa8] sm:$0xff]  ;;  %v690_v41 = vld [vmem:[#allocation2 + $0xa0] sm:$0xff]  ;;  %vm1852_vm6 = vnez %v1797_v47  ;;  %vm1863_vm14 = vmmov %vm1862_vm5  ;;  %vm1864_vm0 = vnez %v1811_v53 }
 0x249   :  { %625 = vst [vmem:[#allocation2 + $0xc0] sm:$0xf] %v621_v34  ;;  %626 = vst [vmem:[#allocation2 + $0xc8] sm:$0xf] %v622_v36  ;;  %v930_v42 = vpack.c.bf16 %v691_v40, %v687_v37  ;;  %v932_v38 = vpack.c.bf16 %v690_v41, %v686_v62 }
 0x24a   :  { %v634_v39 = vpop.permute.xlu0 %633  ;;  %v616_v45 = vpop.permute.xlu1 %615 }
 0x24b   :  { %v617_v5 = vsel %vm1850_vm2, %v614_v10, %v616_v45  ;;  %v620_v35 = vsel %vm1851_vm1, %v616_v45, %v610_v33  ;;  %931 = vmatprep.subr.bf16.mxu0 %v930_v42  ;;  %vm1865_vm2 = vmmov %vm1862_vm5 }
 0x24c   :  { %v623_v46 = vsel %vm1852_vm6, %v617_v5, 0.0  ;;  %v624_v48 = vsel %vm1853_vm9, %v620_v35, 0.0  ;;  %933 = vmatpush1.bf16.msra.mxu0 %v932_v38  ;;  %v693_v52 = vld [vmem:[#allocation2 + $0xb8] sm:$0xff]  ;;  %v692_v28 = vld [vmem:[#allocation2 + $0xb0] sm:$0xff]  ;;  %vm1866_vm1 = vmmov %vm1865_vm2  ;;  %vm1868_vm6 = vnez %v1808_v51  ;;  %vm1869_vm9 = vcmask 588800  }
 0x24d   :  { %627 = vst [vmem:[#allocation2 + $0xd0] sm:$0xf] %v623_v46  ;;  %628 = vst [vmem:[#allocation2 + $0xd8] sm:$0xf] %v624_v48  ;;  %v946_v29 = vpack.c.bf16 %v693_v52, %v689_v49  ;;  %v948_v55 = vpack.c.bf16 %v692_v28, %v688_v11 }
 0x24e   :  { %v632_v30 = vpop.permute.xlu1 %631  ;;  %v650_v47 = vpop.permute.xlu0 %649 }
 0x24f   :  { %v638_v33 = vsel %vm1854_vm15, %v632_v30, %v634_v39  ;;  %v639_v56 = vsel %vm1855_vm12, %v630_v58, %v632_v30  ;;  %947 = vmatprep.subr.bf16.mxu1 %v946_v29  ;;  %vm1870_vm15 = vmmov %vm1869_vm9 }
 0x250   :  { %v641_v44 = vsel %vm1856_vm13, %v639_v56, 0.0  ;;  %v642_v60 = vsel %vm1857_vm3, %v638_v33, 0.0  ;;  %949 = vmatpush1.bf16.msra.mxu1 %v948_v55  ;;  %v695_v0 = vld [vmem:[#allocation2 + $0xc8] sm:$0xff]  ;;  %v694_v18 = vld [vmem:[#allocation2 + $0xc0] sm:$0xff] }
 0x251   :  { %645 = vst [vmem:[#allocation2 + $0xe0] sm:$0xf] %v641_v44  ;;  %646 = vst [vmem:[#allocation2 + $0xe8] sm:$0xf] %v642_v60 }
 0x252   :  { %v636_v61 = vpop.permute.xlu1 %635  ;;  %v654_v21 = vpop.permute.xlu0 %653 }
 0x253   :  { %v637_v63 = vsel %vm1858_vm10, %v634_v39, %v636_v61  ;;  %v640_v20 = vsel %vm1859_vm11, %v636_v61, %v630_v58 }
 0x254   :  { %v643_v6 = vsel %vm1860_vm8, %v637_v63, 0.0  ;;  %v644_v15 = vsel %vm1861_vm4, %v640_v20, 0.0  ;;  %v697_v43 = vld [vmem:[#allocation2 + $0xd8] sm:$0xff]  ;;  %v696_v24 = vld [vmem:[#allocation2 + $0xd0] sm:$0xff] }
 0x255   :  { %647 = vst [vmem:[#allocation2 + $0xf0] sm:$0xf] %v643_v6  ;;  %648 = vst [vmem:[#allocation2 + $0xf8] sm:$0xf] %v644_v15 }
 0x256   :  { %v652_v9 = vpop.permute.xlu1 %651 }
 0x257   :  { %v658_v25 = vsel %vm1862_vm5, %v652_v9, %v654_v21  ;;  %v659_v10 = vsel %vm1863_vm14, %v650_v47, %v652_v9 }
 0x258   :  { %v661_v12 = vsel %vm1476_vm7, %v659_v10, 0.0  ;;  %v662_v27 = vsel %vm1864_vm0, %v658_v25, 0.0  ;;  %v699_v13 = vld [vmem:[#allocation2 + $0xe8] sm:$0xff]  ;;  %v698_v14 = vld [vmem:[#allocation2 + $0xe0] sm:$0xff]  ;;  %vm1867_vm7 = vnez %v1814_v54 }
 0x259   :  { %665 = vst [vmem:[#allocation2 + $0x100] sm:$0xf] %v661_v12  ;;  %666 = vst [vmem:[#allocation2 + $0x108] sm:$0xf] %v662_v27  ;;  %v934_v57 = vpack.c.bf16 %v699_v13, %v695_v0  ;;  %v936_v50 = vpack.c.bf16 %v698_v14, %v694_v18  ;;  %v669_v54 = vld [vmem:[%s1717_s3] sm:$0xf] }
 0x25a   :  { %v656_v16 = vpop.permute.xlu1 %655  ;;  %s1028_s3 = smov [#allocation7]  }
 0x25b   :  { %v657_v17 = vsel %vm1865_vm2, %v654_v21, %v656_v16  ;;  %v660_v19 = vsel %vm1866_vm1, %v656_v16, %v650_v47  ;;  %935 = vmatprep.subr.bf16.mxu0 %v934_v57  ;;  %s877_s22 = sshll.u32 %s1028_s3, 4  ;;  %s878_s22 = int_to_ptr.vmem [resolvable:$true] %s877_s22 }
 0x25c   :  { %v663_v53 = vsel %vm1867_vm7, %v657_v17, 0.0  ;;  %v664_v22 = vsel %vm1868_vm6, %v660_v19, 0.0  ;;  %937 = vmatpush1.bf16.msra.mxu0 %v936_v50  ;;  %v701_v23 = vld [vmem:[#allocation2 + $0xf8] sm:$0xff]  ;;  %v700_v26 = vld [vmem:[#allocation2 + $0xf0] sm:$0xff]  ;;  %s991_s23 = scalar_lea.vmem %s878_s22, 256  ;;  %p996_p9 = scmp.lt.s32.totalorder %s878_s22, %s878_s22 }
 0x25d   :  { %667 = vst [vmem:[#allocation2 + $0x110] sm:$0xf] %v663_v53  ;;  %668 = vst [vmem:[#allocation2 + $0x118] sm:$0xf] %v664_v22  ;;  %v950_v58 = vpack.c.bf16 %v701_v23, %v697_v43  ;;  %v952_v7 = vpack.c.bf16 %v700_v26, %v696_v24  ;;  %p992_p8 = scmp.ne.s32.totalorder %s878_s22, %s991_s23  ;;  %p997_p10 = scmp.lt.s32.totalorder %s991_s23, %s991_s23 }
 0x25f   :  { %951 = vmatprep.subr.bf16.mxu1 %v950_v58  ;;  %p998_p11 = por %p997_p10, %p996_p9 }
 0x260   :  { %953 = vmatpush1.bf16.msra.mxu1 %v952_v7  ;;  %v703_v8 = vld [vmem:[#allocation2 + $0x108] sm:$0xff]  ;;  %v702_v31 = vld [vmem:[#allocation2 + $0x100] sm:$0xff] }
 0x261   :  { %731 = vmatprep.subr.mxu0 %v703_v8  ;;  %p999_p12 = pnand %p998_p11, %p992_p8 }
 0x262   :  { %732 = vmatpush1.msra.mxu0 %v702_v31 }
 0x263   :  { %888 = vmatmul.mubr.msk.f32.vlgmr.msra.gmra.mrb[2].mxu0 %vm1869_vm9, %v669_v54  ;;  %v710_v59 = vpop.permute.xlu0 %709 }
 0x264   :  { %v705_v51 = vld [vmem:[#allocation2 + $0x118] sm:$0xff]  ;;  %v704_v32 = vld [vmem:[#allocation2 + $0x110] sm:$0xff] }
 0x265   :  { %802 = vmatprep.subr.mxu1 %v705_v51 }
 0x266   :  { %803 = vmatpush1.msra.mxu1 %v704_v32 }
 0x267   :  { %889 = vmatmul.mubr.msk.f32.vlgmr.msra.gmra.mrb[2].mxu1 %vm1870_vm15, %v669_v54 }
 0x336   :  { %v781_v62 = vpop.f32.mrb[2].mxu0 }
 0x337   :  { %v782_v34 = vadd.f32 %v781_v62, %v710_v59  ;;  %v783_v36 = vpop.f32.mrb[3].mxu0 }
 0x338   :  { %v784_v37 = vadd.f32 %v783_v36, %v710_v59 }
 0x339   :  { %v857_v40 = vadd.f32 %v782_v34, %v1116_v2 }
 0x33a   :  { %v858_v41 = vadd.f32 %v784_v37, %v1128_v4  ;;  %v852_v42 = vpop.f32.mrb[2].mxu1 }
 0x33b   :  { %v853_v38 = vadd.f32 %v852_v42, %v710_v59  ;;  %v854_v39 = vpop.f32.mrb[3].mxu1 }
 0x33c   :  { %v865_v45 = vcombine.low %v857_v40, %v858_v41  ;;  %v855_v5 = vadd.f32 %v854_v39, %v710_v59 }
 0x33d   :  { %v859_v35 = vadd.f32 %v853_v38, %v1114_v1 }
 0x33e   :  { %869 = vst [vmem:[#allocation7] sm:$0xff] %v865_v45  ;;  %v860_v11 = vadd.f32 %v855_v5, %v1124_v3 }
 0x340   :  { %v866_v46 = vcombine.low %v859_v35, %v860_v11 }
 0x342   :  { %870 = vst [vmem:[#allocation7 + $0x8] sm:$0xff] %v866_v46 }
 0x343   :  { %1002 = shalt.err (!%p999_p12)
}
 0x344   :  { %s1003_s26 = scalar_lea.hbm %s1720_s6, 256 }
 0x345   :  { %p1004_p13 = scmp.ne.s32.totalorder %s1720_s6, %s1003_s26  ;;  %p1007_p0 = scmp.lt.u32.totalorder %s1003_s26, %s1720_s6 }
 0x347   :  { %p1009_p1 = pnand %p1007_p0, %p1004_p13 }
 0x349   :  { %1012 = shalt.err (!%p1009_p1)
}
 0x34a   :  { %880 = dma.vmem_to_hbm [thread:$0]  %s878_s22, 256, %s1720_s6, [#allocation6]  }
 0x34b   :  { %1015 = dma.done.wait [#allocation6], 256  }
 0x34c   :  { %1016 = vsyncadd [#allocation6], 4294967040 }
 0x34d   :  { %884 = vsyncpa [#allocation5], 1 }
 0x34e   :  { %885 = vsyncpa [#allocation6], 1 }

</bundles_post_ra>
